<compile_context>
chip_gen: v7x
topology: tpu7x:2x2x1
jax: 0.10.0
libtpu: 0.0.40
codegen_flags: <defaults>
</compile_context>

<pallas_src>
import jax
import jax.numpy as jnp
from jax.experimental import pallas as pl
from jax.experimental.pallas import tpu as pltpu


def _tile_graph_sum(h_ref, w1_ref, w2_ref):
    """Pooled, W2-projected, fully-scaled contribution of one node tile -> (1,1) f32."""
    # MXU #1: (width, D) @ (D, tile_n) -> (width, tile_n), f32 accumulation.
    z = jnp.dot(w1_ref[...], h_ref[...], preferred_element_type=jnp.float32)
    z = jnp.maximum(z, 0.0).astype(w2_ref.dtype)                  # relu (VPU)
    # MXU #2: (1, width) @ (width, tile_n) -> (1, tile_n); w2 already carries cm/N.
    row = jnp.dot(w2_ref[...], z, preferred_element_type=jnp.float32)
    return jnp.sum(row, axis=1, keepdims=True)                    # single XLU lane-reduce


def gnn_accum_kernel(h_ref, w1_ref, w2_ref, o_ref):
    """Grid axis 'arbitrary': accumulate into the resident (1,1) output block."""
    @pl.when(pl.program_id(0) == 0)
    def _():
        o_ref[...] = jnp.zeros_like(o_ref)
    o_ref[...] += _tile_graph_sum(h_ref, w1_ref, w2_ref)


def gnn_partials_kernel(h_ref, w1_ref, w2_ref, o_ref):
    """Grid axis 'parallel' (v7x megacore): lane-dense per-tile partial sums."""
    o_ref[...] = jnp.broadcast_to(_tile_graph_sum(h_ref, w1_ref, w2_ref), o_ref.shape)


def gnn_forward(hbar, w1, w2, *, tile_n=1024, use_bf16=False, parallel_partials=False):
    """GNN.forward.
    hbar: (N, 5) node features. w1: (width, 5) = f1.weight. w2: (1, width) = f2.weight.
    Returns the (1, 1) graph representation.
    """
    N, D = hbar.shape
    width = w1.shape[0]
    assert w1.shape == (width, D)
    assert w2.shape == (1, width)

    # Fold NTK rescaling cm = 1/sqrt(width) and the 1/N of global_mean_pool
    # into w2 (exact: everything after the relu is linear).
    scale = (1.0 / (width ** 0.5)) / N
    compute_dtype = jnp.bfloat16 if use_bf16 else jnp.float32

    # Lane-dense layout: nodes (the only scaling axis) go on the 128-lane axis.
    # TODO(synk): for very large N, have the producer emit (D, N) directly and
    # skip this XLA transpose pass over hbar.
    hbar_t = jnp.asarray(hbar, jnp.float32).T.astype(compute_dtype)       # (D, N)
    w1_c = jnp.asarray(w1, jnp.float32).astype(compute_dtype)             # (width, D)
    w2_c = (jnp.asarray(w2, jnp.float32) * scale).astype(compute_dtype)   # (1, width)

    # Tile the node axis, 128-lane aligned; small N collapses to one grid step.
    tile_n = max(128, (tile_n // 128) * 128)
    if N <= tile_n:
        tile_n = pl.cdiv(N, 128) * 128
    n_tiles = pl.cdiv(N, tile_n)
    n_padded = n_tiles * tile_n
    if n_padded != N:
        # zero-padded nodes contribute exactly 0 to the pooled sum
        hbar_t = jnp.pad(hbar_t, ((0, 0), (0, n_padded - N)))

    in_specs = [
        pl.BlockSpec((D, tile_n), lambda i: (0, i)),   # node tile, lane-dense
        pl.BlockSpec((width, D), lambda i: (0, 0)),    # W1 resident in VMEM
        pl.BlockSpec((1, width), lambda i: (0, 0)),    # scaled w2, lane-dense, resident
    ]

    if parallel_partials:
        # Independent tiles -> v7x megacore can split the grid across its two
        # TensorCores; a tiny trailing XLA sum combines per-tile partials.
        partials = pl.pallas_call(
            gnn_partials_kernel,
            out_shape=jax.ShapeDtypeStruct((1, n_tiles * 128), jnp.float32),
            grid_spec=pltpu.PrefetchScalarGridSpec(
                num_scalar_prefetch=0,
                grid=(n_tiles,),
                in_specs=in_specs,
                out_specs=pl.BlockSpec((1, 128), lambda i: (0, i)),
            ),
            compiler_params=pltpu.CompilerParams(
                dimension_semantics=("parallel",)),
        )(hbar_t, w1_c, w2_c)
        return jnp.sum(partials.reshape(n_tiles, 128)[:, 0]).reshape(1, 1)

    # Default: in-kernel accumulation (single-TC parts / small N); the kernel
    # output already is the fully-scaled (1, 1) answer -- no trailing XLA ops.
    return pl.pallas_call(
        gnn_accum_kernel,
        out_shape=jax.ShapeDtypeStruct((1, 1), jnp.float32),
        grid_spec=pltpu.PrefetchScalarGridSpec(
            num_scalar_prefetch=0,
            grid=(n_tiles,),
            in_specs=in_specs,
            out_specs=pl.BlockSpec((1, 1), lambda i: (0, 0)),
        ),
        compiler_params=pltpu.CompilerParams(
            dimension_semantics=("arbitrary",)),
    )(hbar_t, w1_c, w2_c)


if __name__ == "__main__":
    key = jax.random.PRNGKey(0)
    k_h, k_w1, k_w2, k_h2 = jax.random.split(key, 4)

    D, width = 5, 2048   # module: Linear(5, width), Linear(width, 1), width default 2048

    def reference(hbar, w1, w2):
        # pure-JAX mirror of the torch forward pass
        cm = 1.0 / jnp.sqrt(jnp.float32(w1.shape[0]))
        x = cm * jnp.maximum(hbar @ w1.T, 0.0)
        y = x @ w2.T
        return jnp.mean(y, axis=0, keepdims=True)   # global_mean_pool, batch=None

    # nn.init.normal_(p, std=1) on both (bias-free) linear weights.
    w1 = jax.random.normal(k_w1, (width, D), dtype=jnp.float32)   # f1.weight
    w2 = jax.random.normal(k_w2, (1, width), dtype=jnp.float32)   # f2.weight

    # 1) small graph (N not a multiple of 128 -> exercises zero-padded node path)
    hbar_small = jax.random.normal(k_h, (37, D), dtype=jnp.float32)
    out = gnn_forward(hbar_small, w1, w2)
    jax.block_until_ready(out)
    ref_small = reference(hbar_small, w1, w2)
    assert out.shape == (1, 1)
    assert jnp.allclose(out, ref_small, atol=1e-4, rtol=1e-4), (out, ref_small)

    # 2) larger graph, multi-tile grid, in-kernel accumulation path
    hbar_big = jax.random.normal(k_h2, (1000, D), dtype=jnp.float32)
    ref_big = reference(hbar_big, w1, w2)
    out_acc = gnn_forward(hbar_big, w1, w2, tile_n=256)
    assert jnp.allclose(out_acc, ref_big, atol=2e-4, rtol=2e-4), (out_acc, ref_big)

    # 3) multi-tile, per-tile parallel partials (v7x megacore form)
    out_par = gnn_forward(hbar_big, w1, w2, tile_n=256, parallel_partials=True)
    assert jnp.allclose(out_par, ref_big, atol=2e-4, rtol=2e-4), (out_par, ref_big)

    # 4) bf16 fast path (v6e/v7x): f32 MXU accumulation, looser tolerance
    out_bf16 = gnn_forward(hbar_small, w1, w2, use_bf16=True)
    assert jnp.allclose(out_bf16, ref_small, atol=3e-2, rtol=3e-2), (out_bf16, ref_small)

    jax.block_until_ready((out, out_acc, out_par, out_bf16))
    print("KERNEL_OK")
</pallas_src>

<mosaic_0001>
module attributes {stable_mosaic.version = 11 : i64} {
  func.func @gnn_accum_kernel(%arg0: i32, %arg1: memref<5x128xf32, #tpu.memory_space<vmem>>, %arg2: memref<2048x5xf32, #tpu.memory_space<vmem>>, %arg3: memref<1x2048xf32, #tpu.memory_space<vmem>>, %arg4: memref<1x1xf32, #tpu.memory_space<vmem>>) attributes {dimension_semantics = [#tpu.dimension_semantics<arbitrary>], iteration_bounds = array<i64: 1>, scalar_prefetch = 0 : i64, scratch_operands = 0 : i64, tpu.core_type = #tpu.core_type<tc>, window_params = [{transform_indices = @transform_0, window_bounds = array<i64: 5, 128>}, {pipeline_mode = #tpu.pipeline_mode<synchronous>, transform_indices = @transform_1, window_bounds = array<i64: 2048, 5>}, {pipeline_mode = #tpu.pipeline_mode<synchronous>, transform_indices = @transform_2, window_bounds = array<i64: 1, 2048>}, {pipeline_mode = #tpu.pipeline_mode<synchronous>, transform_indices = @transform_3, window_bounds = array<i64: 1, 1>}]} {
    %c0_i32 = arith.constant 0 : i32
    %0 = arith.cmpi eq, %arg0, %c0_i32 : i32
    %1 = arith.extui %0 : i1 to i32
    %c0_i32_0 = arith.constant 0 : i32
    %2 = arith.cmpi ne, %1, %c0_i32_0 : i32
    scf.if %2 {
      %cst_13 = arith.constant 0.000000e+00 : f32
      %15 = vector.broadcast %cst_13 : f32 to vector<1x1xf32>
      %c0_14 = arith.constant 0 : index
      %c0_15 = arith.constant 0 : index
      %16 = vector.load %arg4[%c0_14, %c0_15] : memref<1x1xf32, #tpu.memory_space<vmem>>, vector<1x1xf32>
      tpu.vector_store %arg4[%c0_14, %c0_15], %15 {strides = array<i32>} : memref<1x1xf32, #tpu.memory_space<vmem>>, vector<1x1xf32>,
    } else {
    }
    %c0 = arith.constant 0 : index
    %c0_1 = arith.constant 0 : index
    %3 = vector.load %arg4[%c0, %c0_1] : memref<1x1xf32, #tpu.memory_space<vmem>>, vector<1x1xf32>
    %c0_2 = arith.constant 0 : index
    %c0_3 = arith.constant 0 : index
    %4 = vector.load %arg2[%c0_2, %c0_3] : memref<2048x5xf32, #tpu.memory_space<vmem>>, vector<2048x5xf32>
    %c0_4 = arith.constant 0 : index
    %c0_5 = arith.constant 0 : index
    %5 = vector.load %arg1[%c0_4, %c0_5] : memref<5x128xf32, #tpu.memory_space<vmem>>, vector<5x128xf32>
    %cst = arith.constant dense<0.000000e+00> : vector<2048x128xf32>
    %6 = tpu.matmul %4, %5, %cst {dimension_numbers = #tpu.dot_dimension_numbers<[1], [0], [0], [1], [0, 0, 1, 1], [], []>} : vector<2048x5xf32>, vector<5x128xf32>, vector<2048x128xf32> -> vector<2048x128xf32>
    %cst_6 = arith.constant 0.000000e+00 : f32
    %7 = vector.broadcast %cst_6 : f32 to vector<2048x128xf32>
    %8 = arith.maximumf %6, %7 : vector<2048x128xf32>
    %c0_7 = arith.constant 0 : index
    %c0_8 = arith.constant 0 : index
    %9 = vector.load %arg3[%c0_7, %c0_8] : memref<1x2048xf32, #tpu.memory_space<vmem>>, vector<1x2048xf32>
    %cst_9 = arith.constant dense<0.000000e+00> : vector<1x128xf32>
    %10 = tpu.matmul %9, %8, %cst_9 {dimension_numbers = #tpu.dot_dimension_numbers<[1], [0], [0], [1], [0, 0, 1, 1], [], []>} : vector<1x2048xf32>, vector<2048x128xf32>, vector<1x128xf32> -> vector<1x128xf32>
    %cst_10 = arith.constant dense<0.000000e+00> : vector<1xf32>
    %11 = vector.multi_reduction <add>, %10, %cst_10 [1] : vector<1x128xf32> to vector<1xf32>
    %12 = vector.shape_cast %11 : vector<1xf32> to vector<1x1xf32>
    %13 = arith.addf %3, %12 : vector<1x1xf32>
    %c0_11 = arith.constant 0 : index
    %c0_12 = arith.constant 0 : index
    %14 = vector.load %arg4[%c0_11, %c0_12] : memref<1x1xf32, #tpu.memory_space<vmem>>, vector<1x1xf32>
    tpu.vector_store %arg4[%c0_11, %c0_12], %13 {strides = array<i32>} : memref<1x1xf32, #tpu.memory_space<vmem>>, vector<1x1xf32>,
    return
  }
  func.func @transform_0(%arg0: i32) -> (i32, i32) {
    %c0_i32 = arith.constant 0 : i32
    %c0_i32_0 = arith.constant 0 : i32
    return %c0_i32, %arg0 : i32, i32
  }
  func.func @transform_1(%arg0: i32) -> (i32, i32) {
    %c0_i32 = arith.constant 0 : i32
    %c0_i32_0 = arith.constant 0 : i32
    %c0_i32_1 = arith.constant 0 : i32
    return %c0_i32, %c0_i32_0 : i32, i32
  }
  func.func @transform_2(%arg0: i32) -> (i32, i32) {
    %c0_i32 = arith.constant 0 : i32
    %c0_i32_0 = arith.constant 0 : i32
    %c0_i32_1 = arith.constant 0 : i32
    return %c0_i32, %c0_i32_0 : i32, i32
  }
  func.func @transform_3(%arg0: i32) -> (i32, i32) {
    %c0_i32 = arith.constant 0 : i32
    %c0_i32_0 = arith.constant 0 : i32
    %c0_i32_1 = arith.constant 0 : i32
    return %c0_i32, %c0_i32_0 : i32, i32
  }
}

</mosaic_0001>

<bundles_post_ra>
// kernel: tpu_custom_call.1
= control target key start
LH: loop header
LB: loop body
LE: loop exit
PB: predicated region body
PF: predicated region fallthrough
CT: control target
= control target key end

     0   :  { %vm1048_vm0 = vcmask 1044480   ;;  %vm279_vm1 = vcmask 39936   ;;  %s6147_s0 = inlined_call_operand.vmem [shape: f32[5,128], index: 0, kind: input, shape index: {}]   ;;  %s6148_s1 = inlined_call_operand.vmem [shape: f32[2048,5], index: 1, kind: input, shape index: {}]   ;;  %s6149_s2 = inlined_call_operand.vmem [shape: f32[1,2048], index: 2, kind: input, shape index: {}]   ;;  %s6150_s3 = inlined_call_operand.hbm [shape: f32[1,1], index: 3, kind: output, shape index: {}]  }
   0x1   :  { %v278_v0 = vld [vmem:[%s6147_s0] sm:$0x1f]  ;;  %v23_v2 = vld [vmem:[%s6148_s1 + $0x8] sm:$0xff]  ;;  %v24_v3 = vld [vmem:[%s6148_s1 + $0x10] sm:$0xff] }
   0x2   :  { %v22_v1 = vld [vmem:[%s6148_s1] sm:$0xff]  ;;  %4112 = vmatprep.subr.msk.mxu0 %vm1048_vm0, %v278_v0  ;;  %4754 = vmatprep.subr.msk.mxu1 %vm1048_vm0, %v278_v0  ;;  %v25_v4 = vld [vmem:[%s6148_s1 + $0x18] sm:$0xff]  ;;  %v27_v6 = vld [vmem:[%s6148_s1 + $0x28] sm:$0xff] }
   0x3   :  { %4114 = vmatprep.mubr.msk.f32.mxu0 %vm279_vm1, %v22_v1  ;;  %4113 = vmatpush3.msk.msra.mxu0 %vm1048_vm0, %v278_v0  ;;  %v26_v5 = vld [vmem:[%s6148_s1 + $0x20] sm:$0xff]  ;;  %v28_v7 = vld [vmem:[%s6148_s1 + $0x30] sm:$0xff]  ;;  %v29_v8 = vld [vmem:[%s6148_s1 + $0x38] sm:$0xff] }
   0x4   :  { %4115 = vmatmul.mubr.msk.f32.vlgmr.msra.gmra.mrb[0].mxu0 %vm279_vm1, %v23_v2  ;;  %4755 = vmatpush3.msk.msra.mxu1 %vm1048_vm0, %v278_v0  ;;  %v30_v9 = vld [vmem:[%s6148_s1 + $0x40] sm:$0xff]  ;;  %v31_v10 = vld [vmem:[%s6148_s1 + $0x48] sm:$0xff]  ;;  %v32_v11 = vld [vmem:[%s6148_s1 + $0x50] sm:$0xff] }
   0x5   :  { %4117 = vmatprep.mubr.msk.f32.mxu0 %vm279_vm1, %v24_v3  ;;  %v33_v12 = vld [vmem:[%s6148_s1 + $0x58] sm:$0xff]  ;;  %v34_v13 = vld [vmem:[%s6148_s1 + $0x60] sm:$0xff]  ;;  %v35_v14 = vld [vmem:[%s6148_s1 + $0x68] sm:$0xff] }
   0x6   :  { %v36_v15 = vld [vmem:[%s6148_s1 + $0x70] sm:$0xff] }
   0x8   :  { %4118 = vmatmul.mubr.msk.f32.gmra.mrb[2].mxu0 %vm279_vm1, %v25_v4 }
   0x9   :  { %4120 = vmatprep.mubr.msk.f32.mxu0 %vm279_vm1, %v26_v5 }
   0xc   :  { %4121 = vmatmul.mubr.msk.f32.gmra.mrb[4].mxu0 %vm279_vm1, %v27_v6 }
   0xd   :  { %4123 = vmatprep.mubr.msk.f32.mxu0 %vm279_vm1, %v28_v7 }
  0x10   :  { %4124 = vmatmul.mubr.msk.f32.gmra.mrb[6].mxu0 %vm279_vm1, %v29_v8 }
  0x11   :  { %4126 = vmatprep.mubr.msk.f32.mxu0 %vm279_vm1, %v30_v9 }
  0x14   :  { %4127 = vmatmul.mubr.msk.f32.gmra.mrb[8].mxu0 %vm279_vm1, %v31_v10 }
  0x15   :  { %4129 = vmatprep.mubr.msk.f32.mxu0 %vm279_vm1, %v32_v11 }
  0x18   :  { %4130 = vmatmul.mubr.msk.f32.gmra.mrb[10].mxu0 %vm279_vm1, %v33_v12 }
  0x19   :  { %4132 = vmatprep.mubr.msk.f32.mxu0 %vm279_vm1, %v34_v13 }
  0x1a   :  { %8 = vsyncpa [#allocation3], 0  ;;  %v37_v16 = vld [vmem:[%s6148_s1 + $0x78] sm:$0xff]  ;;  %v38_v17 = vld [vmem:[%s6148_s1 + $0x80] sm:$0xff]  ;;  %vm19_vm2 = vcmask 0   ;;  %vm3297_vm3 = vcmask 1040384  }
  0x1b   :  { %v39_v18 = vld [vmem:[%s6148_s1 + $0x88] sm:$0xff]  ;;  %v40_v19 = vld [vmem:[%s6148_s1 + $0x90] sm:$0xff]  ;;  %v41_v20 = vld [vmem:[%s6148_s1 + $0x98] sm:$0xff] }
  0x1c   :  { %4133 = vmatmul.mubr.msk.f32.gmra.mrb[12].mxu0 %vm279_vm1, %v35_v14  ;;  %v42_v21 = vld [vmem:[%s6148_s1 + $0xa0] sm:$0xff]  ;;  %v43_v22 = vld [vmem:[%s6148_s1 + $0xa8] sm:$0xff]  ;;  %v44_v23 = vld [vmem:[%s6148_s1 + $0xb0] sm:$0xff] }
  0x1d   :  { %4135 = vmatprep.mubr.msk.f32.mxu0 %vm279_vm1, %v36_v15  ;;  %v45_v24 = vld [vmem:[%s6148_s1 + $0xb8] sm:$0xff]  ;;  %v46_v25 = vld [vmem:[%s6148_s1 + $0xc0] sm:$0xff]  ;;  %v208_v26 = vld [vmem:[%s6148_s1 + $0x5d0] sm:$0xff] }
  0x1e   :  { %v209_v27 = vld [vmem:[%s6148_s1 + $0x5d8] sm:$0xff]  ;;  %v47_v28 = vld [vmem:[%s6148_s1 + $0xc8] sm:$0xff]  ;;  %4393 = vmatprep.mubr.msk.f32.mxu1 %vm279_vm1, %v208_v26  ;;  %v48_v29 = vld [vmem:[%s6148_s1 + $0xd0] sm:$0xff] }
  0x1f   :  { %4394 = vmatmul.mubr.msk.f32.vlgmr.msra.gmra.mrb[0].mxu1 %vm279_vm1, %v209_v27  ;;  %v210_v30 = vld [vmem:[%s6148_s1 + $0x5e0] sm:$0xff]  ;;  %v211_v31 = vld [vmem:[%s6148_s1 + $0x5e8] sm:$0xff]  ;;  %v49_v32 = vld [vmem:[%s6148_s1 + $0xd8] sm:$0xff] }
  0x20   :  { %4136 = vmatmul.mubr.msk.f32.gmra.mrb[14].mxu0 %vm279_vm1, %v37_v16  ;;  %4396 = vmatprep.mubr.msk.f32.mxu1 %vm279_vm1, %v210_v30  ;;  %v50_v33 = vld [vmem:[%s6148_s1 + $0xe0] sm:$0xff]  ;;  %v212_v34 = vld [vmem:[%s6148_s1 + $0x5f0] sm:$0xff]  ;;  %v213_v35 = vld [vmem:[%s6148_s1 + $0x5f8] sm:$0xff] }
  0x21   :  { %4138 = vmatprep.mubr.msk.f32.mxu0 %vm279_vm1, %v38_v17  ;;  %v51_v36 = vld [vmem:[%s6148_s1 + $0xe8] sm:$0xff]  ;;  %v52_v37 = vld [vmem:[%s6148_s1 + $0xf0] sm:$0xff]  ;;  %v214_v38 = vld [vmem:[%s6148_s1 + $0x600] sm:$0xff] }
  0x22   :  { %v215_v39 = vld [vmem:[%s6148_s1 + $0x608] sm:$0xff]  ;;  %v53_v40 = vld [vmem:[%s6148_s1 + $0xf8] sm:$0xff]  ;;  %v54_v41 = vld [vmem:[%s6148_s1 + $0x100] sm:$0xff] }
  0x23   :  { %4397 = vmatmul.mubr.msk.f32.gmra.mrb[2].mxu1 %vm279_vm1, %v211_v31  ;;  %v216_v42 = vld [vmem:[%s6148_s1 + $0x610] sm:$0xff]  ;;  %v217_v43 = vld [vmem:[%s6148_s1 + $0x618] sm:$0xff]  ;;  %v55_v44 = vld [vmem:[%s6148_s1 + $0x108] sm:$0xff] }
  0x24   :  { %4139 = vmatmul.mubr.msk.f32.gmra.mrb[16].mxu0 %vm279_vm1, %v39_v18  ;;  %4399 = vmatprep.mubr.msk.f32.mxu1 %vm279_vm1, %v212_v34  ;;  %v56_v45 = vld [vmem:[%s6148_s1 + $0x110] sm:$0xff]  ;;  %v218_v46 = vld [vmem:[%s6148_s1 + $0x620] sm:$0xff]  ;;  %v219_v47 = vld [vmem:[%s6148_s1 + $0x628] sm:$0xff] }
  0x25   :  { %4141 = vmatprep.mubr.msk.f32.mxu0 %vm279_vm1, %v40_v19  ;;  %v57_v48 = vld [vmem:[%s6148_s1 + $0x118] sm:$0xff]  ;;  %v58_v49 = vld [vmem:[%s6148_s1 + $0x120] sm:$0xff]  ;;  %v220_v50 = vld [vmem:[%s6148_s1 + $0x630] sm:$0xff] }
  0x26   :  { %v221_v51 = vld [vmem:[%s6148_s1 + $0x638] sm:$0xff]  ;;  %v59_v52 = vld [vmem:[%s6148_s1 + $0x128] sm:$0xff]  ;;  %v60_v53 = vld [vmem:[%s6148_s1 + $0x130] sm:$0xff] }
  0x27   :  { %4400 = vmatmul.mubr.msk.f32.gmra.mrb[4].mxu1 %vm279_vm1, %v213_v35  ;;  %v222_v54 = vld [vmem:[%s6148_s1 + $0x640] sm:$0xff]  ;;  %v223_v55 = vld [vmem:[%s6148_s1 + $0x648] sm:$0xff]  ;;  %v61_v56 = vld [vmem:[%s6148_s1 + $0x138] sm:$0xff] }
  0x28   :  { %4142 = vmatmul.mubr.msk.f32.gmra.mrb[18].mxu0 %vm279_vm1, %v41_v20  ;;  %4402 = vmatprep.mubr.msk.f32.mxu1 %vm279_vm1, %v214_v38  ;;  %v62_v57 = vld [vmem:[%s6148_s1 + $0x140] sm:$0xff]  ;;  %v224_v58 = vld [vmem:[%s6148_s1 + $0x650] sm:$0xff]  ;;  %v225_v59 = vld [vmem:[%s6148_s1 + $0x658] sm:$0xff] }
  0x29   :  { %4144 = vmatprep.mubr.msk.f32.mxu0 %vm279_vm1, %v42_v21  ;;  %v63_v60 = vld [vmem:[%s6148_s1 + $0x148] sm:$0xff]  ;;  %v64_v61 = vld [vmem:[%s6148_s1 + $0x150] sm:$0xff]  ;;  %v226_v62 = vld [vmem:[%s6148_s1 + $0x660] sm:$0xff] }
  0x2a   :  { %v227_v63 = vld [vmem:[%s6148_s1 + $0x668] sm:$0xff]  ;;  %v65_v0 = vld [vmem:[%s6148_s1 + $0x158] sm:$0xff]  ;;  %v66_v1 = vld [vmem:[%s6148_s1 + $0x160] sm:$0xff] }
  0x2b   :  { %4403 = vmatmul.mubr.msk.f32.gmra.mrb[6].mxu1 %vm279_vm1, %v215_v39  ;;  %v228_v2 = vld [vmem:[%s6148_s1 + $0x670] sm:$0xff]  ;;  %v67_v3 = vld [vmem:[%s6148_s1 + $0x168] sm:$0xff]  ;;  %v229_v4 = vld [vmem:[%s6148_s1 + $0x678] sm:$0xff] }
  0x2c   :  { %4145 = vmatmul.mubr.msk.f32.gmra.mrb[20].mxu0 %vm279_vm1, %v43_v22  ;;  %4405 = vmatprep.mubr.msk.f32.mxu1 %vm279_vm1, %v216_v42  ;;  %v68_v5 = vld [vmem:[%s6148_s1 + $0x170] sm:$0xff]  ;;  %v230_v6 = vld [vmem:[%s6148_s1 + $0x680] sm:$0xff]  ;;  %v69_v7 = vld [vmem:[%s6148_s1 + $0x178] sm:$0xff] }
  0x2d   :  { %4147 = vmatprep.mubr.msk.f32.mxu0 %vm279_vm1, %v44_v23  ;;  %v231_v8 = vld [vmem:[%s6148_s1 + $0x688] sm:$0xff]  ;;  %v70_v9 = vld [vmem:[%s6148_s1 + $0x180] sm:$0xff]  ;;  %v232_v10 = vld [vmem:[%s6148_s1 + $0x690] sm:$0xff] }
  0x2e   :  { %v71_v11 = vld [vmem:[%s6148_s1 + $0x188] sm:$0xff]  ;;  %v233_v12 = vld [vmem:[%s6148_s1 + $0x698] sm:$0xff]  ;;  %v72_v13 = vld [vmem:[%s6148_s1 + $0x190] sm:$0xff] }
  0x2f   :  { %4406 = vmatmul.mubr.msk.f32.gmra.mrb[8].mxu1 %vm279_vm1, %v217_v43  ;;  %v234_v14 = vld [vmem:[%s6148_s1 + $0x6a0] sm:$0xff]  ;;  %v73_v15 = vld [vmem:[%s6148_s1 + $0x198] sm:$0xff]  ;;  %v235_v16 = vld [vmem:[%s6148_s1 + $0x6a8] sm:$0xff] }
  0x30   :  { %4148 = vmatmul.mubr.msk.f32.gmra.mrb[22].mxu0 %vm279_vm1, %v45_v24  ;;  %4408 = vmatprep.mubr.msk.f32.mxu1 %vm279_vm1, %v218_v46  ;;  %v74_v17 = vld [vmem:[%s6148_s1 + $0x1a0] sm:$0xff]  ;;  %v236_v18 = vld [vmem:[%s6148_s1 + $0x6b0] sm:$0xff]  ;;  %v75_v19 = vld [vmem:[%s6148_s1 + $0x1a8] sm:$0xff] }
  0x31   :  { %4150 = vmatprep.mubr.msk.f32.mxu0 %vm279_vm1, %v46_v25  ;;  %v237_v20 = vld [vmem:[%s6148_s1 + $0x6b8] sm:$0xff]  ;;  %v76_v21 = vld [vmem:[%s6148_s1 + $0x1b0] sm:$0xff]  ;;  %v238_v22 = vld [vmem:[%s6148_s1 + $0x6c0] sm:$0xff] }
  0x32   :  { %v77_v23 = vld [vmem:[%s6148_s1 + $0x1b8] sm:$0xff]  ;;  %v239_v24 = vld [vmem:[%s6148_s1 + $0x6c8] sm:$0xff]  ;;  %v78_v25 = vld [vmem:[%s6148_s1 + $0x1c0] sm:$0xff] }
  0x33   :  { %4409 = vmatmul.mubr.msk.f32.gmra.mrb[10].mxu1 %vm279_vm1, %v219_v47  ;;  %v240_v26 = vld [vmem:[%s6148_s1 + $0x6d0] sm:$0xff]  ;;  %v79_v27 = vld [vmem:[%s6148_s1 + $0x1c8] sm:$0xff]  ;;  %v242_v30 = vld [vmem:[%s6148_s1 + $0x6e0] sm:$0xff] }
  0x34   :  { %4151 = vmatmul.mubr.msk.f32.gmra.mrb[24].mxu0 %vm279_vm1, %v47_v28  ;;  %4411 = vmatprep.mubr.msk.f32.mxu1 %vm279_vm1, %v220_v50  ;;  %v241_v28 = vld [vmem:[%s6148_s1 + $0x6d8] sm:$0xff]  ;;  %v244_v34 = vld [vmem:[%s6148_s1 + $0x6f0] sm:$0xff]  ;;  %v83_v35 = vld [vmem:[%s6148_s1 + $0x1e8] sm:$0xff] }
  0x35   :  { %4153 = vmatprep.mubr.msk.f32.mxu0 %vm279_vm1, %v48_v29  ;;  %v80_v29 = vld [vmem:[%s6148_s1 + $0x1d0] sm:$0xff]  ;;  %v81_v31 = vld [vmem:[%s6148_s1 + $0x1d8] sm:$0xff]  ;;  %v246_v38 = vld [vmem:[%s6148_s1 + $0x700] sm:$0xff] }
  0x36   :  { %v85_v39 = vld [vmem:[%s6148_s1 + $0x1f8] sm:$0xff]  ;;  %v248_v42 = vld [vmem:[%s6148_s1 + $0x710] sm:$0xff]  ;;  %v87_v43 = vld [vmem:[%s6148_s1 + $0x208] sm:$0xff] }
  0x37   :  { %4412 = vmatmul.mubr.msk.f32.gmra.mrb[12].mxu1 %vm279_vm1, %v221_v51  ;;  %v250_v46 = vld [vmem:[%s6148_s1 + $0x720] sm:$0xff]  ;;  %v89_v47 = vld [vmem:[%s6148_s1 + $0x218] sm:$0xff]  ;;  %v252_v50 = vld [vmem:[%s6148_s1 + $0x730] sm:$0xff] }
  0x38   :  { %4154 = vmatmul.mubr.msk.f32.gmra.mrb[26].mxu0 %vm279_vm1, %v49_v32  ;;  %4414 = vmatprep.mubr.msk.f32.mxu1 %vm279_vm1, %v222_v54  ;;  %v243_v32 = vld [vmem:[%s6148_s1 + $0x6e8] sm:$0xff]  ;;  %v254_v54 = vld [vmem:[%s6148_s1 + $0x740] sm:$0xff] }
  0x39   :  { %4156 = vmatprep.mubr.msk.f32.mxu0 %vm279_vm1, %v50_v33  ;;  %v82_v33 = vld [vmem:[%s6148_s1 + $0x1e0] sm:$0xff]  ;;  %v91_v51 = vld [vmem:[%s6148_s1 + $0x228] sm:$0xff] }
  0x3b   :  { %4415 = vmatmul.mubr.msk.f32.gmra.mrb[14].mxu1 %vm279_vm1, %v223_v55  ;;  %v93_v55 = vld [vmem:[%s6148_s1 + $0x238] sm:$0xff] }
  0x3c   :  { %4157 = vmatmul.mubr.msk.f32.gmra.mrb[28].mxu0 %vm279_vm1, %v51_v36  ;;  %4417 = vmatprep.mubr.msk.f32.mxu1 %vm279_vm1, %v224_v58  ;;  %v245_v36 = vld [vmem:[%s6148_s1 + $0x6f8] sm:$0xff]  ;;  %v256_v58 = vld [vmem:[%s6148_s1 + $0x750] sm:$0xff] }
  0x3d   :  { %4159 = vmatprep.mubr.msk.f32.mxu0 %vm279_vm1, %v52_v37  ;;  %v84_v37 = vld [vmem:[%s6148_s1 + $0x1f0] sm:$0xff] }
  0x3f   :  { %4418 = vmatmul.mubr.msk.f32.gmra.mrb[16].mxu1 %vm279_vm1, %v225_v59  ;;  %v95_v59 = vld [vmem:[%s6148_s1 + $0x248] sm:$0xff] }
  0x40   :  { %4160 = vmatmul.mubr.msk.f32.gmra.mrb[30].mxu0 %vm279_vm1, %v53_v40  ;;  %4420 = vmatprep.mubr.msk.f32.mxu1 %vm279_vm1, %v226_v62  ;;  %v247_v40 = vld [vmem:[%s6148_s1 + $0x708] sm:$0xff]  ;;  %v258_v62 = vld [vmem:[%s6148_s1 + $0x760] sm:$0xff] }
  0x41   :  { %4162 = vmatprep.mubr.msk.f32.mxu0 %vm279_vm1, %v54_v41  ;;  %v86_v41 = vld [vmem:[%s6148_s1 + $0x200] sm:$0xff] }
  0x43   :  { %4421 = vmatmul.mubr.msk.f32.gmra.mrb[18].mxu1 %vm279_vm1, %v227_v63  ;;  %v97_v63 = vld [vmem:[%s6148_s1 + $0x258] sm:$0xff] }
  0x44   :  { %4163 = vmatmul.mubr.msk.f32.gmra.mrb[32].mxu0 %vm279_vm1, %v55_v44  ;;  %4423 = vmatprep.mubr.msk.f32.mxu1 %vm279_vm1, %v228_v2  ;;  %v249_v44 = vld [vmem:[%s6148_s1 + $0x718] sm:$0xff]  ;;  %v260_v2 = vld [vmem:[%s6148_s1 + $0x770] sm:$0xff] }
  0x45   :  { %4165 = vmatprep.mubr.msk.f32.mxu0 %vm279_vm1, %v56_v45  ;;  %v88_v45 = vld [vmem:[%s6148_s1 + $0x210] sm:$0xff] }
  0x47   :  { %4424 = vmatmul.mubr.msk.f32.gmra.mrb[20].mxu1 %vm279_vm1, %v229_v4  ;;  %v261_v4 = vld [vmem:[%s6148_s1 + $0x778] sm:$0xff] }
  0x48   :  { %4166 = vmatmul.mubr.msk.f32.gmra.mrb[34].mxu0 %vm279_vm1, %v57_v48  ;;  %4426 = vmatprep.mubr.msk.f32.mxu1 %vm279_vm1, %v230_v6  ;;  %v251_v48 = vld [vmem:[%s6148_s1 + $0x728] sm:$0xff]  ;;  %v262_v6 = vld [vmem:[%s6148_s1 + $0x780] sm:$0xff] }
  0x49   :  { %4168 = vmatprep.mubr.msk.f32.mxu0 %vm279_vm1, %v58_v49  ;;  %v90_v49 = vld [vmem:[%s6148_s1 + $0x220] sm:$0xff] }
  0x4b   :  { %4427 = vmatmul.mubr.msk.f32.gmra.mrb[22].mxu1 %vm279_vm1, %v231_v8  ;;  %v263_v8 = vld [vmem:[%s6148_s1 + $0x788] sm:$0xff] }
  0x4c   :  { %4169 = vmatmul.mubr.msk.f32.gmra.mrb[36].mxu0 %vm279_vm1, %v59_v52  ;;  %4429 = vmatprep.mubr.msk.f32.mxu1 %vm279_vm1, %v232_v10  ;;  %v253_v52 = vld [vmem:[%s6148_s1 + $0x738] sm:$0xff]  ;;  %v264_v10 = vld [vmem:[%s6148_s1 + $0x790] sm:$0xff] }
  0x4d   :  { %4171 = vmatprep.mubr.msk.f32.mxu0 %vm279_vm1, %v60_v53  ;;  %v92_v53 = vld [vmem:[%s6148_s1 + $0x230] sm:$0xff] }
  0x4f   :  { %4430 = vmatmul.mubr.msk.f32.gmra.mrb[24].mxu1 %vm279_vm1, %v233_v12  ;;  %v265_v12 = vld [vmem:[%s6148_s1 + $0x798] sm:$0xff] }
  0x50   :  { %4172 = vmatmul.mubr.msk.f32.gmra.mrb[38].mxu0 %vm279_vm1, %v61_v56  ;;  %4432 = vmatprep.mubr.msk.f32.mxu1 %vm279_vm1, %v234_v14  ;;  %v255_v56 = vld [vmem:[%s6148_s1 + $0x748] sm:$0xff]  ;;  %v266_v14 = vld [vmem:[%s6148_s1 + $0x7a0] sm:$0xff] }
  0x51   :  { %4174 = vmatprep.mubr.msk.f32.mxu0 %vm279_vm1, %v62_v57  ;;  %v94_v57 = vld [vmem:[%s6148_s1 + $0x240] sm:$0xff] }
  0x53   :  { %4433 = vmatmul.mubr.msk.f32.gmra.mrb[26].mxu1 %vm279_vm1, %v235_v16  ;;  %v267_v16 = vld [vmem:[%s6148_s1 + $0x7a8] sm:$0xff] }
  0x54   :  { %4175 = vmatmul.mubr.msk.f32.gmra.mrb[40].mxu0 %vm279_vm1, %v63_v60  ;;  %4435 = vmatprep.mubr.msk.f32.mxu1 %vm279_vm1, %v236_v18  ;;  %v257_v60 = vld [vmem:[%s6148_s1 + $0x758] sm:$0xff]  ;;  %v268_v18 = vld [vmem:[%s6148_s1 + $0x7b0] sm:$0xff] }
  0x55   :  { %4177 = vmatprep.mubr.msk.f32.mxu0 %vm279_vm1, %v64_v61  ;;  %v96_v61 = vld [vmem:[%s6148_s1 + $0x250] sm:$0xff] }
  0x57   :  { %4436 = vmatmul.mubr.msk.f32.gmra.mrb[28].mxu1 %vm279_vm1, %v237_v20  ;;  %v269_v20 = vld [vmem:[%s6148_s1 + $0x7b8] sm:$0xff] }
  0x58   :  { %4178 = vmatmul.mubr.msk.f32.gmra.mrb[42].mxu0 %vm279_vm1, %v65_v0  ;;  %4438 = vmatprep.mubr.msk.f32.mxu1 %vm279_vm1, %v238_v22  ;;  %v259_v0 = vld [vmem:[%s6148_s1 + $0x768] sm:$0xff]  ;;  %v270_v22 = vld [vmem:[%s6148_s1 + $0x7c0] sm:$0xff] }
  0x59   :  { %4180 = vmatprep.mubr.msk.f32.mxu0 %vm279_vm1, %v66_v1  ;;  %v98_v1 = vld [vmem:[%s6148_s1 + $0x260] sm:$0xff] }
  0x5b   :  { %4439 = vmatmul.mubr.msk.f32.gmra.mrb[30].mxu1 %vm279_vm1, %v239_v24  ;;  %v271_v24 = vld [vmem:[%s6148_s1 + $0x7c8] sm:$0xff] }
  0x5c   :  { %4181 = vmatmul.mubr.msk.f32.gmra.mrb[44].mxu0 %vm279_vm1, %v67_v3  ;;  %4441 = vmatprep.mubr.msk.f32.mxu1 %vm279_vm1, %v240_v26  ;;  %v99_v3 = vld [vmem:[%s6148_s1 + $0x268] sm:$0xff]  ;;  %v272_v26 = vld [vmem:[%s6148_s1 + $0x7d0] sm:$0xff] }
  0x5d   :  { %4183 = vmatprep.mubr.msk.f32.mxu0 %vm279_vm1, %v68_v5  ;;  %v100_v5 = vld [vmem:[%s6148_s1 + $0x270] sm:$0xff] }
  0x5f   :  { %4442 = vmatmul.mubr.msk.f32.gmra.mrb[32].mxu1 %vm279_vm1, %v241_v28  ;;  %v273_v28 = vld [vmem:[%s6148_s1 + $0x7d8] sm:$0xff] }
  0x60   :  { %4184 = vmatmul.mubr.msk.f32.gmra.mrb[46].mxu0 %vm279_vm1, %v69_v7  ;;  %4444 = vmatprep.mubr.msk.f32.mxu1 %vm279_vm1, %v242_v30  ;;  %v101_v7 = vld [vmem:[%s6148_s1 + $0x278] sm:$0xff]  ;;  %v274_v30 = vld [vmem:[%s6148_s1 + $0x7e0] sm:$0xff] }
  0x61   :  { %4186 = vmatprep.mubr.msk.f32.mxu0 %vm279_vm1, %v70_v9  ;;  %v102_v9 = vld [vmem:[%s6148_s1 + $0x280] sm:$0xff] }
  0x63   :  { %4445 = vmatmul.mubr.msk.f32.gmra.mrb[34].mxu1 %vm279_vm1, %v243_v32  ;;  %v275_v32 = vld [vmem:[%s6148_s1 + $0x7e8] sm:$0xff] }
  0x64   :  { %4187 = vmatmul.mubr.msk.f32.gmra.mrb[48].mxu0 %vm279_vm1, %v71_v11  ;;  %4447 = vmatprep.mubr.msk.f32.mxu1 %vm279_vm1, %v244_v34  ;;  %v103_v11 = vld [vmem:[%s6148_s1 + $0x288] sm:$0xff]  ;;  %v114_v34 = vld [vmem:[%s6148_s1 + $0x2e0] sm:$0xff] }
  0x65   :  { %4189 = vmatprep.mubr.msk.f32.mxu0 %vm279_vm1, %v72_v13  ;;  %v104_v13 = vld [vmem:[%s6148_s1 + $0x290] sm:$0xff] }
  0x67   :  { %4448 = vmatmul.mubr.msk.f32.gmra.mrb[36].mxu1 %vm279_vm1, %v245_v36  ;;  %v276_v36 = vld [vmem:[%s6148_s1 + $0x7f0] sm:$0xff] }
  0x68   :  { %4190 = vmatmul.mubr.msk.f32.gmra.mrb[50].mxu0 %vm279_vm1, %v73_v15  ;;  %4450 = vmatprep.mubr.msk.f32.mxu1 %vm279_vm1, %v246_v38  ;;  %v105_v15 = vld [vmem:[%s6148_s1 + $0x298] sm:$0xff] }
  0x69   :  { %4192 = vmatprep.mubr.msk.f32.mxu0 %vm279_vm1, %v74_v17  ;;  %v106_v17 = vld [vmem:[%s6148_s1 + $0x2a0] sm:$0xff]  ;;  %v277_v38 = vld [vmem:[%s6148_s1 + $0x7f8] sm:$0xff] }
  0x6b   :  { %4451 = vmatmul.mubr.msk.f32.gmra.mrb[38].mxu1 %vm279_vm1, %v247_v40  ;;  %v116_v40 = vld [vmem:[%s6148_s1 + $0x2f0] sm:$0xff] }
  0x6c   :  { %4193 = vmatmul.mubr.msk.f32.gmra.mrb[52].mxu0 %vm279_vm1, %v75_v19  ;;  %4453 = vmatprep.mubr.msk.f32.mxu1 %vm279_vm1, %v248_v42  ;;  %v107_v19 = vld [vmem:[%s6148_s1 + $0x2a8] sm:$0xff] }
  0x6d   :  { %4195 = vmatprep.mubr.msk.f32.mxu0 %vm279_vm1, %v76_v21  ;;  %v108_v21 = vld [vmem:[%s6148_s1 + $0x2b0] sm:$0xff] }
  0x6f   :  { %4454 = vmatmul.mubr.msk.f32.gmra.mrb[40].mxu1 %vm279_vm1, %v249_v44  ;;  %v118_v44 = vld [vmem:[%s6148_s1 + $0x300] sm:$0xff] }
  0x70   :  { %4196 = vmatmul.mubr.msk.f32.gmra.mrb[54].mxu0 %vm279_vm1, %v77_v23  ;;  %4456 = vmatprep.mubr.msk.f32.mxu1 %vm279_vm1, %v250_v46  ;;  %v109_v23 = vld [vmem:[%s6148_s1 + $0x2b8] sm:$0xff]  ;;  %v120_v46 = vld [vmem:[%s6148_s1 + $0x310] sm:$0xff] }
  0x71   :  { %4198 = vmatprep.mubr.msk.f32.mxu0 %vm279_vm1, %v78_v25  ;;  %v110_v25 = vld [vmem:[%s6148_s1 + $0x2c0] sm:$0xff] }
  0x73   :  { %4457 = vmatmul.mubr.msk.f32.gmra.mrb[42].mxu1 %vm279_vm1, %v251_v48  ;;  %v122_v48 = vld [vmem:[%s6148_s1 + $0x320] sm:$0xff] }
  0x74   :  { %4199 = vmatmul.mubr.msk.f32.gmra.mrb[56].mxu0 %vm279_vm1, %v79_v27  ;;  %4459 = vmatprep.mubr.msk.f32.mxu1 %vm279_vm1, %v252_v50  ;;  %v111_v27 = vld [vmem:[%s6148_s1 + $0x2c8] sm:$0xff]  ;;  %v124_v50 = vld [vmem:[%s6148_s1 + $0x330] sm:$0xff] }
  0x75   :  { %4201 = vmatprep.mubr.msk.f32.mxu0 %vm279_vm1, %v80_v29  ;;  %v112_v29 = vld [vmem:[%s6148_s1 + $0x2d0] sm:$0xff] }
  0x77   :  { %4460 = vmatmul.mubr.msk.f32.gmra.mrb[44].mxu1 %vm279_vm1, %v253_v52  ;;  %v126_v52 = vld [vmem:[%s6148_s1 + $0x340] sm:$0xff] }
  0x78   :  { %4202 = vmatmul.mubr.msk.f32.gmra.mrb[58].mxu0 %vm279_vm1, %v81_v31  ;;  %4462 = vmatprep.mubr.msk.f32.mxu1 %vm279_vm1, %v254_v54  ;;  %v113_v31 = vld [vmem:[%s6148_s1 + $0x2d8] sm:$0xff]  ;;  %v128_v54 = vld [vmem:[%s6148_s1 + $0x350] sm:$0xff] }
  0x79   :  { %4204 = vmatprep.mubr.msk.f32.mxu0 %vm279_vm1, %v82_v33  ;;  %v2657_v33 = vlaneseq }
  0x7b   :  { %4463 = vmatmul.mubr.msk.f32.gmra.mrb[46].mxu1 %vm279_vm1, %v255_v56  ;;  %v130_v56 = vld [vmem:[%s6148_s1 + $0x360] sm:$0xff] }
  0x7c   :  { %4205 = vmatmul.mubr.msk.f32.gmra.mrb[60].mxu0 %vm279_vm1, %v83_v35  ;;  %4465 = vmatprep.mubr.msk.f32.mxu1 %vm279_vm1, %v256_v58  ;;  %v5450_v35 = vshrl.u32 %v2657_v33, 7  ;;  %v142_v33 = vld [vmem:[%s6148_s1 + $0x3c0] sm:$0xff] }
  0x7d   :  { %4207 = vmatprep.mubr.msk.f32.mxu0 %vm279_vm1, %v84_v37  ;;  %v115_v37 = vld [vmem:[%s6148_s1 + $0x2e8] sm:$0xff] }
  0x7f   :  { %4466 = vmatmul.mubr.msk.f32.gmra.mrb[48].mxu1 %vm279_vm1, %v257_v60 }
  0x80   :  { %4208 = vmatmul.mubr.msk.f32.gmra.mrb[62].mxu0 %vm279_vm1, %v85_v39  ;;  %4468 = vmatprep.mubr.msk.f32.mxu1 %vm279_vm1, %v258_v62  ;;  %v2663_v39 = vsub.s32 1, %v5450_v35  ;;  %v132_v62 = vld [vmem:[%s6148_s1 + $0x370] sm:$0xff] }
  0x81   :  { %4210 = vmatprep.mubr.msk.f32.mxu0 %vm279_vm1, %v86_v41  ;;  %v5472_v41 = vld [vmem:[%s6149_s2] sm:$0xff] }
  0x82   :  { %v2664_v42 = vrot.slane %v5472_v41, %v2663_v39 }
  0x83   :  { %4469 = vmatmul.mubr.msk.f32.gmra.mrb[50].mxu1 %vm279_vm1, %v259_v0 }
  0x84   :  { %4211 = vmatmul.mubr.msk.f32.gmra.mrb[64].mxu0 %vm279_vm1, %v87_v43  ;;  %4471 = vmatprep.mubr.msk.f32.mxu1 %vm279_vm1, %v260_v2  ;;  %v117_v43 = vld [vmem:[%s6148_s1 + $0x2f8] sm:$0xff] }
  0x85   :  { %4213 = vmatprep.mubr.msk.f32.mxu0 %vm279_vm1, %v88_v45  ;;  %v119_v45 = vld [vmem:[%s6148_s1 + $0x308] sm:$0xff] }
  0x87   :  { %4472 = vmatmul.mubr.msk.f32.gmra.mrb[52].mxu1 %vm279_vm1, %v261_v4  ;;  %v133_v4 = vld [vmem:[%s6148_s1 + $0x378] sm:$0xff] }
  0x88   :  { %4214 = vmatmul.mubr.msk.f32.gmra.mrb[66].mxu0 %vm279_vm1, %v89_v47  ;;  %4474 = vmatprep.mubr.msk.f32.mxu1 %vm279_vm1, %v262_v6  ;;  %v121_v47 = vld [vmem:[%s6148_s1 + $0x318] sm:$0xff] }
  0x89   :  { %4216 = vmatprep.mubr.msk.f32.mxu0 %vm279_vm1, %v90_v49  ;;  %v123_v49 = vld [vmem:[%s6148_s1 + $0x328] sm:$0xff] }
  0x8b   :  { %4475 = vmatmul.mubr.msk.f32.gmra.mrb[54].mxu1 %vm279_vm1, %v263_v8 }
  0x8c   :  { %4217 = vmatmul.mubr.msk.f32.gmra.mrb[68].mxu0 %vm279_vm1, %v91_v51  ;;  %4477 = vmatprep.mubr.msk.f32.mxu1 %vm279_vm1, %v264_v10  ;;  %v125_v51 = vld [vmem:[%s6148_s1 + $0x338] sm:$0xff] }
  0x8d   :  { %4219 = vmatprep.mubr.msk.f32.mxu0 %vm279_vm1, %v92_v53  ;;  %v127_v53 = vld [vmem:[%s6148_s1 + $0x348] sm:$0xff] }
  0x8f   :  { %4478 = vmatmul.mubr.msk.f32.gmra.mrb[56].mxu1 %vm279_vm1, %v265_v12  ;;  %v136_v12 = vld [vmem:[%s6148_s1 + $0x390] sm:$0xff] }
  0x90   :  { %4220 = vmatmul.mubr.msk.f32.gmra.mrb[70].mxu0 %vm279_vm1, %v93_v55  ;;  %4480 = vmatprep.mubr.msk.f32.mxu1 %vm279_vm1, %v266_v14  ;;  %v129_v55 = vld [vmem:[%s6148_s1 + $0x358] sm:$0xff] }
  0x91   :  { %4222 = vmatprep.mubr.msk.f32.mxu0 %vm279_vm1, %v94_v57 }
  0x93   :  { %4481 = vmatmul.mubr.msk.f32.gmra.mrb[58].mxu1 %vm279_vm1, %v267_v16 }
  0x94   :  { %4223 = vmatmul.mubr.msk.f32.gmra.mrb[72].mxu0 %vm279_vm1, %v95_v59  ;;  %4483 = vmatprep.mubr.msk.f32.mxu1 %vm279_vm1, %v268_v18  ;;  %v137_v18 = vld [vmem:[%s6148_s1 + $0x398] sm:$0xff] }
  0x95   :  { %4225 = vmatprep.mubr.msk.f32.mxu0 %vm279_vm1, %v96_v61  ;;  %v131_v61 = vld [vmem:[%s6148_s1 + $0x368] sm:$0xff] }
  0x97   :  { %4484 = vmatmul.mubr.msk.f32.gmra.mrb[60].mxu1 %vm279_vm1, %v269_v20 }
  0x98   :  { %4226 = vmatmul.mubr.msk.f32.gmra.mrb[74].mxu0 %vm279_vm1, %v97_v63  ;;  %4486 = vmatprep.mubr.msk.f32.mxu1 %vm279_vm1, %v270_v22 }
  0x99   :  { %4228 = vmatprep.mubr.msk.f32.mxu0 %vm279_vm1, %v98_v1 }
  0x9b   :  { %4487 = vmatmul.mubr.msk.f32.gmra.mrb[62].mxu1 %vm279_vm1, %v271_v24 }
  0x9c   :  { %4229 = vmatmul.mubr.msk.f32.gmra.mrb[76].mxu0 %vm279_vm1, %v99_v3  ;;  %4489 = vmatprep.mubr.msk.f32.mxu1 %vm279_vm1, %v272_v26  ;;  %v140_v26 = vld [vmem:[%s6148_s1 + $0x3b0] sm:$0xff] }
  0x9d   :  { %4231 = vmatprep.mubr.msk.f32.mxu0 %vm279_vm1, %v100_v5  ;;  %v134_v5 = vld [vmem:[%s6148_s1 + $0x380] sm:$0xff] }
  0x9f   :  { %4490 = vmatmul.mubr.msk.f32.gmra.mrb[64].mxu1 %vm279_vm1, %v273_v28 }
  0xa0   :  { %4232 = vmatmul.mubr.msk.f32.gmra.mrb[78].mxu0 %vm279_vm1, %v101_v7  ;;  %4492 = vmatprep.mubr.msk.f32.mxu1 %vm279_vm1, %v274_v30 }
  0xa1   :  { %4234 = vmatprep.mubr.msk.f32.mxu0 %vm279_vm1, %v102_v9 }
  0xa3   :  { %4493 = vmatmul.mubr.msk.f32.gmra.mrb[66].mxu1 %vm279_vm1, %v275_v32  ;;  %v141_v32 = vld [vmem:[%s6148_s1 + $0x3b8] sm:$0xff] }
  0xa4   :  { %4235 = vmatmul.mubr.msk.f32.gmra.mrb[80].mxu0 %vm279_vm1, %v103_v11  ;;  %4495 = vmatprep.mubr.msk.f32.mxu1 %vm279_vm1, %v276_v36  ;;  %v135_v11 = vld [vmem:[%s6148_s1 + $0x388] sm:$0xff] }
  0xa5   :  { %4237 = vmatprep.mubr.msk.f32.mxu0 %vm279_vm1, %v104_v13 }
  0xa7   :  { %4496 = vmatmul.mubr.msk.f32.gmra.mrb[68].mxu1 %vm279_vm1, %v277_v38 }
  0xa8   :  { %4238 = vmatmul.mubr.msk.f32.gmra.mrb[82].mxu0 %vm279_vm1, %v105_v15  ;;  %2801 = vmatprep.mubr.f32.mxu1 %v2664_v42  ;;  %v143_v42 = vld [vmem:[%s6148_s1 + $0x3c8] sm:$0xff] }
  0xa9   :  { %4240 = vmatprep.mubr.msk.f32.mxu0 %vm279_vm1, %v106_v17 }
  0xac   :  { %4241 = vmatmul.mubr.msk.f32.gmra.mrb[84].mxu0 %vm279_vm1, %v107_v19  ;;  %v138_v19 = vld [vmem:[%s6148_s1 + $0x3a0] sm:$0xff] }
  0xad   :  { %4243 = vmatprep.mubr.msk.f32.mxu0 %vm279_vm1, %v108_v21 }
  0xb0   :  { %4244 = vmatmul.mubr.msk.f32.gmra.mrb[86].mxu0 %vm279_vm1, %v109_v23 }
  0xb1   :  { %4246 = vmatprep.mubr.msk.f32.mxu0 %vm279_vm1, %v110_v25  ;;  %v139_v25 = vld [vmem:[%s6148_s1 + $0x3a8] sm:$0xff] }
  0xb4   :  { %4247 = vmatmul.mubr.msk.f32.gmra.mrb[88].mxu0 %vm279_vm1, %v111_v27 }
  0xb5   :  { %4249 = vmatprep.mubr.msk.f32.mxu0 %vm279_vm1, %v112_v29 }
  0xb8   :  { %4250 = vmatmul.mubr.msk.f32.gmra.mrb[90].mxu0 %vm279_vm1, %v113_v31 }
  0xb9   :  { %4252 = vmatprep.mubr.msk.f32.mxu0 %vm279_vm1, %v114_v34 }
  0xbc   :  { %4253 = vmatmul.mubr.msk.f32.gmra.mrb[92].mxu0 %vm279_vm1, %v115_v37 }
  0xbd   :  { %4255 = vmatprep.mubr.msk.f32.mxu0 %vm279_vm1, %v116_v40 }
  0xc0   :  { %4256 = vmatmul.mubr.msk.f32.gmra.mrb[94].mxu0 %vm279_vm1, %v117_v43  ;;  %v144_v43 = vld [vmem:[%s6148_s1 + $0x3d0] sm:$0xff] }
  0xc1   :  { %4258 = vmatprep.mubr.msk.f32.mxu0 %vm279_vm1, %v118_v44 }
  0xc4   :  { %4259 = vmatmul.mubr.msk.f32.gmra.mrb[96].mxu0 %vm279_vm1, %v119_v45 }
  0xc5   :  { %4261 = vmatprep.mubr.msk.f32.mxu0 %vm279_vm1, %v120_v46 }
  0xc8   :  { %4262 = vmatmul.mubr.msk.f32.gmra.mrb[98].mxu0 %vm279_vm1, %v121_v47 }
  0xc9   :  { %4264 = vmatprep.mubr.msk.f32.mxu0 %vm279_vm1, %v122_v48 }
  0xcc   :  { %4265 = vmatmul.mubr.msk.f32.gmra.mrb[100].mxu0 %vm279_vm1, %v123_v49  ;;  %v145_v49 = vld [vmem:[%s6148_s1 + $0x3d8] sm:$0xff] }
  0xcd   :  { %4267 = vmatprep.mubr.msk.f32.mxu0 %vm279_vm1, %v124_v50  ;;  %v146_v50 = vld [vmem:[%s6148_s1 + $0x3e0] sm:$0xff] }
  0xd0   :  { %4268 = vmatmul.mubr.msk.f32.gmra.mrb[102].mxu0 %vm279_vm1, %v125_v51 }
  0xd1   :  { %4270 = vmatprep.mubr.msk.f32.mxu0 %vm279_vm1, %v126_v52 }
  0xd4   :  { %4271 = vmatmul.mubr.msk.f32.gmra.mrb[104].mxu0 %vm279_vm1, %v127_v53 }
  0xd5   :  { %4273 = vmatprep.mubr.msk.f32.mxu0 %vm279_vm1, %v128_v54 }
  0xd7   :  { %v4116_v57 = vpop.f32.mrb[0].mxu0 }
  0xd8   :  { %v2398_v58 = vmax.f32 %v4116_v57, 0.0  ;;  %v1118_v59 = vpop.f32.mrb[1].mxu0  ;;  %4274 = vmatmul.mubr.msk.f32.gmra.mrb[106].mxu0 %vm279_vm1, %v129_v55  ;;  %v148_v57 = vld [vmem:[%s6148_s1 + $0x3f0] sm:$0xff] }
  0xd9   :  { %v2397_v60 = vmax.f32 %v1118_v59, 0.0  ;;  %4276 = vmatprep.mubr.msk.f32.mxu0 %vm279_vm1, %v130_v56  ;;  %v147_v56 = vld [vmem:[%s6148_s1 + $0x3e8] sm:$0xff] }
  0xdb   :  { %v5541_v63 = vpack.c.bf16 %v2398_v58, %v2397_v60  ;;  %v4119_v0 = vpop.f32.mrb[2].mxu0 }
  0xdc   :  { %v2400_v1 = vmax.f32 %v4119_v0, 0.0  ;;  %v1128_v2 = vpop.f32.mrb[3].mxu0  ;;  %4277 = vmatmul.mubr.msk.f32.gmra.mrb[108].mxu0 %vm279_vm1, %v131_v61  ;;  %v149_v0 = vld [vmem:[%s6148_s1 + $0x3f8] sm:$0xff] }
  0xdd   :  { %v2399_v3 = vmax.f32 %v1128_v2, 0.0  ;;  %4279 = vmatprep.mubr.msk.f32.mxu0 %vm279_vm1, %v132_v62 }
  0xdf   :  { %v5551_v6 = vpack.c.bf16 %v2400_v1, %v2399_v3  ;;  %v4122_v7 = vpop.f32.mrb[4].mxu0  ;;  %v150_v1 = vld [vmem:[%s6148_s1 + $0x400] sm:$0xff] }
  0xe0   :  { %v2402_v8 = vmax.f32 %v4122_v7, 0.0  ;;  %v1138_v9 = vpop.f32.mrb[5].mxu0  ;;  %4280 = vmatmul.mubr.msk.f32.gmra.mrb[110].mxu0 %vm279_vm1, %v133_v4 }
  0xe1   :  { %v2401_v10 = vmax.f32 %v1138_v9, 0.0  ;;  %4282 = vmatprep.mubr.msk.f32.mxu0 %vm279_vm1, %v134_v5 }
  0xe3   :  { %v5561_v13 = vpack.c.bf16 %v2402_v8, %v2401_v10  ;;  %v4125_v14 = vpop.f32.mrb[6].mxu0  ;;  %v151_v8 = vld [vmem:[%s6148_s1 + $0x408] sm:$0xff] }
  0xe4   :  { %v2404_v15 = vmax.f32 %v4125_v14, 0.0  ;;  %v1148_v16 = vpop.f32.mrb[7].mxu0  ;;  %4283 = vmatmul.mubr.msk.f32.gmra.mrb[112].mxu0 %vm279_vm1, %v135_v11 }
  0xe5   :  { %v2403_v17 = vmax.f32 %v1148_v16, 0.0  ;;  %4285 = vmatprep.mubr.msk.f32.mxu0 %vm279_vm1, %v136_v12 }
  0xe7   :  { %v5571_v20 = vpack.c.bf16 %v2404_v15, %v2403_v17  ;;  %v4128_v21 = vpop.f32.mrb[8].mxu0  ;;  %v153_v15 = vld [vmem:[%s6148_s1 + $0x418] sm:$0xff] }
  0xe8   :  { %v2406_v22 = vmax.f32 %v4128_v21, 0.0  ;;  %v1158_v23 = vpop.f32.mrb[9].mxu0  ;;  %4286 = vmatmul.mubr.msk.f32.gmra.mrb[114].mxu0 %vm279_vm1, %v137_v18 }
  0xe9   :  { %v2405_v24 = vmax.f32 %v1158_v23, 0.0  ;;  %4288 = vmatprep.mubr.msk.f32.mxu0 %vm279_vm1, %v138_v19 }
  0xeb   :  { %v5581_v27 = vpack.c.bf16 %v2406_v22, %v2405_v24  ;;  %v4131_v28 = vpop.f32.mrb[10].mxu0  ;;  %v155_v22 = vld [vmem:[%s6148_s1 + $0x428] sm:$0xff] }
  0xec   :  { %v2408_v29 = vmax.f32 %v4131_v28, 0.0  ;;  %v1168_v30 = vpop.f32.mrb[11].mxu0  ;;  %4289 = vmatmul.mubr.msk.f32.gmra.mrb[116].mxu0 %vm279_vm1, %v139_v25 }
  0xed   :  { %v2407_v31 = vmax.f32 %v1168_v30, 0.0  ;;  %4291 = vmatprep.mubr.msk.f32.mxu0 %vm279_vm1, %v140_v26 }
  0xef   :  { %v5591_v34 = vpack.c.bf16 %v2408_v29, %v2407_v31  ;;  %v4134_v36 = vpop.f32.mrb[12].mxu0  ;;  %v157_v29 = vld [vmem:[%s6148_s1 + $0x438] sm:$0xff] }
  0xf0   :  { %v2410_v37 = vmax.f32 %v4134_v36, 0.0  ;;  %v1178_v38 = vpop.f32.mrb[13].mxu0  ;;  %4292 = vmatmul.mubr.msk.f32.gmra.mrb[118].mxu0 %vm279_vm1, %v141_v32 }
  0xf1   :  { %v2409_v40 = vmax.f32 %v1178_v38, 0.0  ;;  %4294 = vmatprep.mubr.msk.f32.mxu0 %vm279_vm1, %v142_v33 }
  0xf3   :  { %v5601_v44 = vpack.c.bf16 %v2410_v37, %v2409_v40  ;;  %v4137_v45 = vpop.f32.mrb[14].mxu0  ;;  %v159_v37 = vld [vmem:[%s6148_s1 + $0x448] sm:$0xff] }
  0xf4   :  { %v2412_v46 = vmax.f32 %v4137_v45, 0.0  ;;  %v1188_v47 = vpop.f32.mrb[15].mxu0  ;;  %4295 = vmatmul.mubr.msk.f32.gmra.mrb[120].mxu0 %vm279_vm1, %v143_v42 }
  0xf5   :  { %v2411_v48 = vmax.f32 %v1188_v47, 0.0  ;;  %4297 = vmatprep.mubr.msk.f32.mxu0 %vm279_vm1, %v144_v43  ;;  %v162_v47 = vld [vmem:[%s6148_s1 + $0x460] sm:$0xff] }
  0xf7   :  { %v5611_v51 = vpack.c.bf16 %v2412_v46, %v2411_v48  ;;  %v4140_v52 = vpop.f32.mrb[16].mxu0  ;;  %v161_v46 = vld [vmem:[%s6148_s1 + $0x458] sm:$0xff]  ;;  %v2671_v48 = vsub.s32 3, %v5450_v35 }
  0xf8   :  { %v2414_v53 = vmax.f32 %v4140_v52, 0.0  ;;  %v1198_v54 = vpop.f32.mrb[17].mxu0  ;;  %4298 = vmatmul.mubr.msk.f32.gmra.mrb[122].mxu0 %vm279_vm1, %v145_v49 }
  0xf9   :  { %v2413_v55 = vmax.f32 %v1198_v54, 0.0  ;;  %4300 = vmatprep.mubr.msk.f32.mxu0 %vm279_vm1, %v146_v50 }
  0xfb   :  { %v4498_v58 = vpack.c.bf16 %v2414_v53, %v2413_v55  ;;  %v4143_v59 = vpop.f32.mrb[18].mxu0 }
  0xfc   :  { %v2416_v60 = vmax.f32 %v4143_v59, 0.0  ;;  %v1208_v61 = vpop.f32.mrb[19].mxu0  ;;  %4301 = vmatmul.mubr.msk.f32.gmra.mrb[124].mxu0 %vm279_vm1, %v147_v56  ;;  %v164_v56 = vld [vmem:[%s6148_s1 + $0x470] sm:$0xff] }
  0xfd   :  { %v2415_v62 = vmax.f32 %v1208_v61, 0.0  ;;  %4499 = vmatprep.subr.bf16.mxu1 %v4498_v58  ;;  %4303 = vmatprep.mubr.msk.f32.mxu0 %vm279_vm1, %v148_v57  ;;  %v2672_v57 = vrot.slane %v5472_v41, %v2671_v48 }
  0xfe   :  { %4501 = vmatpush3.bf16.msra.mxu1 %v5541_v63  ;;  %v152_v63 = vld [vmem:[%s6148_s1 + $0x410] sm:$0xff] }
  0xff   :  { %v4502_v2 = vpack.c.bf16 %v2416_v60, %v2415_v62  ;;  %v4146_v3 = vpop.f32.mrb[20].mxu0 }
 0x100   :  { %v2418_v4 = vmax.f32 %v4146_v3, 0.0  ;;  %v1218_v5 = vpop.f32.mrb[21].mxu0  ;;  %4304 = vmatmul.mubr.msk.f32.gmra.mrb[126].mxu0 %vm279_vm1, %v149_v0  ;;  %v166_v0 = vld [vmem:[%s6148_s1 + $0x480] sm:$0xff] }
 0x101   :  { %v2417_v7 = vmax.f32 %v1218_v5, 0.0  ;;  %4503 = vmatprep.subr.bf16.mxu1 %v4502_v2  ;;  %4306 = vmatprep.mubr.msk.f32.mxu0 %vm279_vm1, %v150_v1 }
 0x102   :  { %4505 = vmatpush3.bf16.msra.mxu1 %v5551_v6  ;;  %v154_v6 = vld [vmem:[%s6148_s1 + $0x420] sm:$0xff] }
 0x103   :  { %v4506_v9 = vpack.c.bf16 %v2418_v4, %v2417_v7  ;;  %v4149_v10 = vpop.f32.mrb[22].mxu0  ;;  %v167_v7 = vld [vmem:[%s6148_s1 + $0x488] sm:$0xff] }
 0x104   :  { %v2420_v11 = vmax.f32 %v4149_v10, 0.0  ;;  %v1228_v12 = vpop.f32.mrb[23].mxu0  ;;  %4307 = vmatmul.mubr.msk.f32.gmra.mrb[128].mxu0 %vm279_vm1, %v151_v8  ;;  %v168_v8 = vld [vmem:[%s6148_s1 + $0x490] sm:$0xff] }
 0x105   :  { %v2419_v14 = vmax.f32 %v1228_v12, 0.0  ;;  %4507 = vmatprep.subr.bf16.mxu1 %v4506_v9  ;;  %4309 = vmatprep.mubr.msk.f32.mxu0 %vm279_vm1, %v152_v63 }
 0x106   :  { %4509 = vmatpush3.bf16.msra.mxu1 %v5561_v13  ;;  %v156_v13 = vld [vmem:[%s6148_s1 + $0x430] sm:$0xff] }
 0x107   :  { %v4510_v16 = vpack.c.bf16 %v2420_v11, %v2419_v14  ;;  %v4152_v17 = vpop.f32.mrb[24].mxu0  ;;  %v169_v14 = vld [vmem:[%s6148_s1 + $0x498] sm:$0xff] }
 0x108   :  { %v2422_v18 = vmax.f32 %v4152_v17, 0.0  ;;  %v1238_v19 = vpop.f32.mrb[25].mxu0  ;;  %4310 = vmatmul.mubr.msk.f32.gmra.mrb[130].mxu0 %vm279_vm1, %v153_v15  ;;  %v170_v15 = vld [vmem:[%s6148_s1 + $0x4a0] sm:$0xff] }
 0x109   :  { %v2421_v21 = vmax.f32 %v1238_v19, 0.0  ;;  %4511 = vmatprep.subr.bf16.mxu1 %v4510_v16  ;;  %4312 = vmatprep.mubr.msk.f32.mxu0 %vm279_vm1, %v154_v6 }
 0x10a   :  { %4513 = vmatpush3.bf16.msra.mxu1 %v5571_v20  ;;  %v158_v20 = vld [vmem:[%s6148_s1 + $0x440] sm:$0xff] }
 0x10b   :  { %v4514_v23 = vpack.c.bf16 %v2422_v18, %v2421_v21  ;;  %v4155_v24 = vpop.f32.mrb[26].mxu0  ;;  %v171_v21 = vld [vmem:[%s6148_s1 + $0x4a8] sm:$0xff] }
 0x10c   :  { %v2424_v25 = vmax.f32 %v4155_v24, 0.0  ;;  %v1248_v26 = vpop.f32.mrb[27].mxu0  ;;  %4313 = vmatmul.mubr.msk.f32.gmra.mrb[132].mxu0 %vm279_vm1, %v155_v22  ;;  %v172_v22 = vld [vmem:[%s6148_s1 + $0x4b0] sm:$0xff] }
 0x10d   :  { %v2423_v28 = vmax.f32 %v1248_v26, 0.0  ;;  %4515 = vmatprep.subr.bf16.mxu1 %v4514_v23  ;;  %4315 = vmatprep.mubr.msk.f32.mxu0 %vm279_vm1, %v156_v13 }
 0x10e   :  { %4517 = vmatpush3.bf16.msra.mxu1 %v5581_v27  ;;  %v160_v27 = vld [vmem:[%s6148_s1 + $0x450] sm:$0xff] }
 0x10f   :  { %v4518_v30 = vpack.c.bf16 %v2424_v25, %v2423_v28  ;;  %v4158_v31 = vpop.f32.mrb[28].mxu0  ;;  %v173_v28 = vld [vmem:[%s6148_s1 + $0x4b8] sm:$0xff] }
 0x110   :  { %v2426_v32 = vmax.f32 %v4158_v31, 0.0  ;;  %v1258_v33 = vpop.f32.mrb[29].mxu0  ;;  %4316 = vmatmul.mubr.msk.f32.gmra.mrb[134].mxu0 %vm279_vm1, %v157_v29  ;;  %v174_v29 = vld [vmem:[%s6148_s1 + $0x4c0] sm:$0xff] }
 0x111   :  { %v2425_v36 = vmax.f32 %v1258_v33, 0.0  ;;  %4519 = vmatprep.subr.bf16.mxu1 %v4518_v30  ;;  %4318 = vmatprep.mubr.msk.f32.mxu0 %vm279_vm1, %v158_v20 }
 0x112   :  { %4521 = vmatpush3.bf16.msra.mxu1 %v5591_v34  ;;  %v2659_v34 = vsub.s32 0, %v5450_v35 }
 0x113   :  { %v4522_v38 = vpack.c.bf16 %v2426_v32, %v2425_v36  ;;  %v4161_v40 = vpop.f32.mrb[30].mxu0  ;;  %v175_v36 = vld [vmem:[%s6148_s1 + $0x4c8] sm:$0xff] }
 0x114   :  { %v2428_v42 = vmax.f32 %v4161_v40, 0.0  ;;  %v1268_v43 = vpop.f32.mrb[31].mxu0  ;;  %4319 = vmatmul.mubr.msk.f32.gmra.mrb[136].mxu0 %vm279_vm1, %v159_v37  ;;  %v2660_v55 = vrot.slane %v5472_v41, %v2659_v34  ;;  %v176_v37 = vld [vmem:[%s6148_s1 + $0x4d0] sm:$0xff] }
 0x115   :  { %v2427_v45 = vmax.f32 %v1268_v43, 0.0  ;;  %4523 = vmatprep.subr.bf16.mxu1 %v4522_v38  ;;  %4321 = vmatprep.mubr.msk.f32.mxu0 %vm279_vm1, %v160_v27 }
 0x116   :  { %4525 = vmatpush3.bf16.msra.mxu1 %v5601_v44  ;;  %v163_v44 = vld [vmem:[%s6148_s1 + $0x468] sm:$0xff] }
 0x117   :  { %v4526_v49 = vpack.c.bf16 %v2428_v42, %v2427_v45  ;;  %v4164_v50 = vpop.f32.mrb[32].mxu0  ;;  %v177_v45 = vld [vmem:[%s6148_s1 + $0x4d8] sm:$0xff] }
 0x118   :  { %v2430_v52 = vmax.f32 %v4164_v50, 0.0  ;;  %v1278_v53 = vpop.f32.mrb[33].mxu0  ;;  %4322 = vmatmul.mubr.msk.f32.gmra.mrb[138].mxu0 %vm279_vm1, %v161_v46  ;;  %v178_v46 = vld [vmem:[%s6148_s1 + $0x4e0] sm:$0xff] }
 0x119   :  { %v2429_v54 = vmax.f32 %v1278_v53, 0.0  ;;  %4527 = vmatprep.subr.bf16.mxu1 %v4526_v49  ;;  %4324 = vmatprep.mubr.msk.f32.mxu0 %vm279_vm1, %v162_v47 }
 0x11a   :  { %4529 = vmatpush3.bf16.msra.mxu1 %v5611_v51  ;;  %v165_v51 = vld [vmem:[%s6148_s1 + $0x478] sm:$0xff] }
 0x11b   :  { %v5701_v58 = vpack.c.bf16 %v2430_v52, %v2429_v54  ;;  %v4167_v59 = vpop.f32.mrb[34].mxu0  ;;  %v179_v54 = vld [vmem:[%s6148_s1 + $0x4e8] sm:$0xff] }
 0x11c   :  { %v2432_v60 = vmax.f32 %v4167_v59, 0.0  ;;  %v1288_v61 = vpop.f32.mrb[35].mxu0  ;;  %4325 = vmatmul.mubr.msk.f32.gmra.mrb[140].mxu0 %vm279_vm1, %v163_v44  ;;  %v180_v44 = vld [vmem:[%s6148_s1 + $0x4f0] sm:$0xff] }
 0x11d   :  { %v2431_v62 = vmax.f32 %v1288_v61, 0.0  ;;  %4327 = vmatprep.mubr.msk.f32.mxu0 %vm279_vm1, %v164_v56  ;;  %2802 = vmatmul.mubr.f32.vlgmr.msra.gmra.mrb[70].mxu1 %v2660_v55  ;;  %v181_v61 = vld [vmem:[%s6148_s1 + $0x4f8] sm:$0xff] }
 0x11e   :  { %2871 = vmatprep.mubr.f32.mxu1 %v2672_v57 }
 0x11f   :  { %v5711_v1 = vpack.c.bf16 %v2432_v60, %v2431_v62  ;;  %v4170_v2 = vpop.f32.mrb[36].mxu0  ;;  %v182_v62 = vld [vmem:[%s6148_s1 + $0x500] sm:$0xff] }
 0x120   :  { %v2434_v3 = vmax.f32 %v4170_v2, 0.0  ;;  %v1298_v4 = vpop.f32.mrb[37].mxu0  ;;  %4328 = vmatmul.mubr.msk.f32.gmra.mrb[142].mxu0 %vm279_vm1, %v165_v51 }
 0x121   :  { %v2433_v5 = vmax.f32 %v1298_v4, 0.0  ;;  %4330 = vmatprep.mubr.msk.f32.mxu0 %vm279_vm1, %v166_v0 }
 0x123   :  { %v5721_v63 = vpack.c.bf16 %v2434_v3, %v2433_v5  ;;  %v4173_v9 = vpop.f32.mrb[38].mxu0  ;;  %v183_v5 = vld [vmem:[%s6148_s1 + $0x508] sm:$0xff] }
 0x124   :  { %v2436_v10 = vmax.f32 %v4173_v9, 0.0  ;;  %v1308_v11 = vpop.f32.mrb[39].mxu0  ;;  %4331 = vmatmul.mubr.msk.f32.gmra.mrb[144].mxu0 %vm279_vm1, %v167_v7 }
 0x125   :  { %v2435_v12 = vmax.f32 %v1308_v11, 0.0  ;;  %4333 = vmatprep.mubr.msk.f32.mxu0 %vm279_vm1, %v168_v8 }
 0x127   :  { %v5731_v6 = vpack.c.bf16 %v2436_v10, %v2435_v12  ;;  %v4176_v16 = vpop.f32.mrb[40].mxu0  ;;  %v185_v12 = vld [vmem:[%s6148_s1 + $0x518] sm:$0xff] }
 0x128   :  { %v2438_v17 = vmax.f32 %v4176_v16, 0.0  ;;  %v1318_v18 = vpop.f32.mrb[41].mxu0  ;;  %4334 = vmatmul.mubr.msk.f32.gmra.mrb[146].mxu0 %vm279_vm1, %v169_v14 }
 0x129   :  { %v2437_v19 = vmax.f32 %v1318_v18, 0.0  ;;  %4336 = vmatprep.mubr.msk.f32.mxu0 %vm279_vm1, %v170_v15 }
 0x12b   :  { %v5741_v13 = vpack.c.bf16 %v2438_v17, %v2437_v19  ;;  %v4179_v23 = vpop.f32.mrb[42].mxu0  ;;  %v187_v19 = vld [vmem:[%s6148_s1 + $0x528] sm:$0xff] }
 0x12c   :  { %v2440_v24 = vmax.f32 %v4179_v23, 0.0  ;;  %v1328_v25 = vpop.f32.mrb[43].mxu0  ;;  %4337 = vmatmul.mubr.msk.f32.gmra.mrb[148].mxu0 %vm279_vm1, %v171_v21 }
 0x12d   :  { %v2439_v26 = vmax.f32 %v1328_v25, 0.0  ;;  %4339 = vmatprep.mubr.msk.f32.mxu0 %vm279_vm1, %v172_v22 }
 0x12f   :  { %v5751_v20 = vpack.c.bf16 %v2440_v24, %v2439_v26  ;;  %v4182_v30 = vpop.f32.mrb[44].mxu0  ;;  %v189_v26 = vld [vmem:[%s6148_s1 + $0x538] sm:$0xff] }
 0x130   :  { %v2442_v31 = vmax.f32 %v4182_v30, 0.0  ;;  %v1338_v32 = vpop.f32.mrb[45].mxu0  ;;  %4340 = vmatmul.mubr.msk.f32.gmra.mrb[150].mxu0 %vm279_vm1, %v173_v28 }
 0x131   :  { %v2441_v33 = vmax.f32 %v1338_v32, 0.0  ;;  %4342 = vmatprep.mubr.msk.f32.mxu0 %vm279_vm1, %v174_v29 }
 0x133   :  { %v5761_v27 = vpack.c.bf16 %v2442_v31, %v2441_v33  ;;  %v4185_v38 = vpop.f32.mrb[46].mxu0  ;;  %v191_v33 = vld [vmem:[%s6148_s1 + $0x548] sm:$0xff] }
 0x134   :  { %v2444_v40 = vmax.f32 %v4185_v38, 0.0  ;;  %v1348_v42 = vpop.f32.mrb[47].mxu0  ;;  %4343 = vmatmul.mubr.msk.f32.gmra.mrb[152].mxu0 %vm279_vm1, %v175_v36 }
 0x135   :  { %v2443_v43 = vmax.f32 %v1348_v42, 0.0  ;;  %4345 = vmatprep.mubr.msk.f32.mxu0 %vm279_vm1, %v176_v37 }
 0x137   :  { %v5771_v47 = vpack.c.bf16 %v2444_v40, %v2443_v43  ;;  %v4188_v49 = vpop.f32.mrb[48].mxu0  ;;  %v193_v43 = vld [vmem:[%s6148_s1 + $0x558] sm:$0xff] }
 0x138   :  { %v2446_v50 = vmax.f32 %v4188_v49, 0.0  ;;  %v1358_v52 = vpop.f32.mrb[49].mxu0  ;;  %4346 = vmatmul.mubr.msk.f32.gmra.mrb[154].mxu0 %vm279_vm1, %v177_v45  ;;  %v194_v45 = vld [vmem:[%s6148_s1 + $0x560] sm:$0xff] }
 0x139   :  { %v2445_v53 = vmax.f32 %v1358_v52, 0.0  ;;  %4348 = vmatprep.mubr.msk.f32.mxu0 %vm279_vm1, %v178_v46  ;;  %v6154_v46 = vsub.s32 5, %v5450_v35 }
 0x13b   :  { %v4530_v55 = vpack.c.bf16 %v2446_v50, %v2445_v53  ;;  %v4191_v56 = vpop.f32.mrb[50].mxu0 }
 0x13c   :  { %v2448_v57 = vmax.f32 %v4191_v56, 0.0  ;;  %v1368_v59 = vpop.f32.mrb[51].mxu0  ;;  %4349 = vmatmul.mubr.msk.f32.gmra.mrb[156].mxu0 %vm279_vm1, %v179_v54  ;;  %v2680_v56 = vrot.slane %v5472_v41, %v6154_v46 }
 0x13d   :  { %v2447_v60 = vmax.f32 %v1368_v59, 0.0  ;;  %4531 = vmatprep.subr.bf16.mxu1 %v4530_v55  ;;  %4351 = vmatprep.mubr.msk.f32.mxu0 %vm279_vm1, %v180_v44  ;;  %v196_v55 = vld [vmem:[%s6148_s1 + $0x570] sm:$0xff] }
 0x13e   :  { %4533 = vmatpush3.bf16.msra.mxu1 %v5701_v58  ;;  %v184_v58 = vld [vmem:[%s6148_s1 + $0x510] sm:$0xff] }
 0x13f   :  { %v4534_v51 = vpack.c.bf16 %v2448_v57, %v2447_v60  ;;  %v4194_v0 = vpop.f32.mrb[52].mxu0 }
 0x140   :  { %v2450_v2 = vmax.f32 %v4194_v0, 0.0  ;;  %v1378_v3 = vpop.f32.mrb[53].mxu0  ;;  %4352 = vmatmul.mubr.msk.f32.gmra.mrb[158].mxu0 %vm279_vm1, %v181_v61 }
 0x141   :  { %v2449_v4 = vmax.f32 %v1378_v3, 0.0  ;;  %4535 = vmatprep.subr.bf16.mxu1 %v4534_v51  ;;  %4354 = vmatprep.mubr.msk.f32.mxu0 %vm279_vm1, %v182_v62  ;;  %v198_v51 = vld [vmem:[%s6148_s1 + $0x580] sm:$0xff] }
 0x142   :  { %4537 = vmatpush3.bf16.msra.mxu1 %v5711_v1  ;;  %v186_v1 = vld [vmem:[%s6148_s1 + $0x520] sm:$0xff] }
 0x143   :  { %v4538_v7 = vpack.c.bf16 %v2450_v2, %v2449_v4  ;;  %v4197_v8 = vpop.f32.mrb[54].mxu0 }
 0x144   :  { %v2452_v9 = vmax.f32 %v4197_v8, 0.0  ;;  %v1388_v10 = vpop.f32.mrb[55].mxu0  ;;  %4355 = vmatmul.mubr.msk.f32.gmra.mrb[160].mxu0 %vm279_vm1, %v183_v5  ;;  %v199_v5 = vld [vmem:[%s6148_s1 + $0x588] sm:$0xff] }
 0x145   :  { %v2451_v11 = vmax.f32 %v1388_v10, 0.0  ;;  %4539 = vmatprep.subr.bf16.mxu1 %v4538_v7  ;;  %4357 = vmatprep.mubr.msk.f32.mxu0 %vm279_vm1, %v184_v58  ;;  %v200_v58 = vld [vmem:[%s6148_s1 + $0x590] sm:$0xff] }
 0x146   :  { %4541 = vmatpush3.bf16.msra.mxu1 %v5721_v63  ;;  %v188_v63 = vld [vmem:[%s6148_s1 + $0x530] sm:$0xff] }
 0x147   :  { %v4542_v14 = vpack.c.bf16 %v2452_v9, %v2451_v11  ;;  %v4200_v15 = vpop.f32.mrb[56].mxu0 }
 0x148   :  { %v2454_v16 = vmax.f32 %v4200_v15, 0.0  ;;  %v1398_v17 = vpop.f32.mrb[57].mxu0  ;;  %4358 = vmatmul.mubr.msk.f32.gmra.mrb[162].mxu0 %vm279_vm1, %v185_v12  ;;  %v201_v12 = vld [vmem:[%s6148_s1 + $0x598] sm:$0xff] }
 0x149   :  { %v2453_v18 = vmax.f32 %v1398_v17, 0.0  ;;  %4543 = vmatprep.subr.bf16.mxu1 %v4542_v14  ;;  %4360 = vmatprep.mubr.msk.f32.mxu0 %vm279_vm1, %v186_v1  ;;  %v202_v1 = vld [vmem:[%s6148_s1 + $0x5a0] sm:$0xff] }
 0x14a   :  { %4545 = vmatpush3.bf16.msra.mxu1 %v5731_v6  ;;  %v190_v6 = vld [vmem:[%s6148_s1 + $0x540] sm:$0xff] }
 0x14b   :  { %v4546_v21 = vpack.c.bf16 %v2454_v16, %v2453_v18  ;;  %v4203_v22 = vpop.f32.mrb[58].mxu0 }
 0x14c   :  { %v2456_v23 = vmax.f32 %v4203_v22, 0.0  ;;  %v1408_v24 = vpop.f32.mrb[59].mxu0  ;;  %4361 = vmatmul.mubr.msk.f32.gmra.mrb[164].mxu0 %vm279_vm1, %v187_v19  ;;  %v203_v19 = vld [vmem:[%s6148_s1 + $0x5a8] sm:$0xff] }
 0x14d   :  { %v2455_v25 = vmax.f32 %v1408_v24, 0.0  ;;  %4547 = vmatprep.subr.bf16.mxu1 %v4546_v21  ;;  %4363 = vmatprep.mubr.msk.f32.mxu0 %vm279_vm1, %v188_v63  ;;  %v204_v63 = vld [vmem:[%s6148_s1 + $0x5b0] sm:$0xff] }
 0x14e   :  { %4549 = vmatpush3.bf16.msra.mxu1 %v5741_v13  ;;  %v192_v13 = vld [vmem:[%s6148_s1 + $0x550] sm:$0xff] }
 0x14f   :  { %v4550_v28 = vpack.c.bf16 %v2456_v23, %v2455_v25  ;;  %v4206_v29 = vpop.f32.mrb[60].mxu0 }
 0x150   :  { %v2458_v30 = vmax.f32 %v4206_v29, 0.0  ;;  %v1418_v31 = vpop.f32.mrb[61].mxu0  ;;  %4364 = vmatmul.mubr.msk.f32.gmra.mrb[166].mxu0 %vm279_vm1, %v189_v26  ;;  %v205_v26 = vld [vmem:[%s6148_s1 + $0x5b8] sm:$0xff] }
 0x151   :  { %v2457_v32 = vmax.f32 %v1418_v31, 0.0  ;;  %4551 = vmatprep.subr.bf16.mxu1 %v4550_v28  ;;  %4366 = vmatprep.mubr.msk.f32.mxu0 %vm279_vm1, %v190_v6  ;;  %v206_v6 = vld [vmem:[%s6148_s1 + $0x5c0] sm:$0xff] }
 0x152   :  { %4553 = vmatpush3.bf16.msra.mxu1 %v5751_v20  ;;  %v6155_v20 = vsub.s32 2, %v5450_v35 }
 0x153   :  { %v4554_v36 = vpack.c.bf16 %v2458_v30, %v2457_v32  ;;  %v4209_v37 = vpop.f32.mrb[62].mxu0 }
 0x154   :  { %v2460_v38 = vmax.f32 %v4209_v37, 0.0  ;;  %v1428_v40 = vpop.f32.mrb[63].mxu0  ;;  %4367 = vmatmul.mubr.msk.f32.gmra.mrb[168].mxu0 %vm279_vm1, %v191_v33  ;;  %v2668_v44 = vrot.slane %v5472_v41, %v6155_v20  ;;  %v207_v33 = vld [vmem:[%s6148_s1 + $0x5c8] sm:$0xff] }
 0x155   :  { %v2459_v42 = vmax.f32 %v1428_v40, 0.0  ;;  %4555 = vmatprep.subr.bf16.mxu1 %v4554_v36  ;;  %4369 = vmatprep.mubr.msk.f32.mxu0 %vm279_vm1, %v192_v13 }
 0x156   :  { %4557 = vmatpush3.bf16.msra.mxu1 %v5761_v27  ;;  %v195_v27 = vld [vmem:[%s6148_s1 + $0x568] sm:$0xff] }
 0x157   :  { %v4558_v49 = vpack.c.bf16 %v2460_v38, %v2459_v42  ;;  %v4212_v50 = vpop.f32.mrb[64].mxu0 }
 0x158   :  { %v2462_v52 = vmax.f32 %v4212_v50, 0.0  ;;  %v1438_v53 = vpop.f32.mrb[65].mxu0  ;;  %4370 = vmatmul.mubr.msk.f32.gmra.mrb[170].mxu0 %vm279_vm1, %v193_v43 }
 0x159   :  { %v2461_v54 = vmax.f32 %v1438_v53, 0.0  ;;  %4559 = vmatprep.subr.bf16.mxu1 %v4558_v49  ;;  %4372 = vmatprep.mubr.msk.f32.mxu0 %vm279_vm1, %v194_v45 }
 0x15a   :  { %4561 = vmatpush3.bf16.msra.mxu1 %v5771_v47  ;;  %v197_v47 = vld [vmem:[%s6148_s1 + $0x578] sm:$0xff] }
 0x15b   :  { %v5861_v57 = vpack.c.bf16 %v2462_v52, %v2461_v54  ;;  %v4215_v59 = vpop.f32.mrb[66].mxu0 }
 0x15c   :  { %v2464_v60 = vmax.f32 %v4215_v59, 0.0  ;;  %v1448_v61 = vpop.f32.mrb[67].mxu0  ;;  %4373 = vmatmul.mubr.msk.f32.gmra.mrb[172].mxu0 %vm279_vm1, %v195_v27 }
 0x15d   :  { %v2463_v62 = vmax.f32 %v1448_v61, 0.0  ;;  %4375 = vmatprep.mubr.msk.f32.mxu0 %vm279_vm1, %v196_v55  ;;  %2872 = vmatmul.mubr.f32.vlgmr.msra.gmra.mrb[72].mxu1 %v2668_v44 }
 0x15e   :  { %2941 = vmatprep.mubr.f32.mxu1 %v2680_v56 }
 0x15f   :  { %v5871_v41 = vpack.c.bf16 %v2464_v60, %v2463_v62  ;;  %v4218_v0 = vpop.f32.mrb[68].mxu0 }
 0x160   :  { %v2466_v2 = vmax.f32 %v4218_v0, 0.0  ;;  %v1458_v3 = vpop.f32.mrb[69].mxu0  ;;  %4376 = vmatmul.mubr.msk.f32.gmra.mrb[174].mxu0 %vm279_vm1, %v197_v47 }
 0x161   :  { %v2465_v4 = vmax.f32 %v1458_v3, 0.0  ;;  %4378 = vmatprep.mubr.msk.f32.mxu0 %vm279_vm1, %v198_v51 }
 0x163   :  { %v5881_v7 = vpack.c.bf16 %v2466_v2, %v2465_v4  ;;  %v4221_v8 = vpop.f32.mrb[70].mxu0  ;;  %v4395_v2 = vpop.f32.mrb[0].mxu1 }
 0x164   :  { %v2468_v9 = vmax.f32 %v4221_v8, 0.0  ;;  %v1468_v10 = vpop.f32.mrb[71].mxu0  ;;  %4379 = vmatmul.mubr.msk.f32.gmra.mrb[176].mxu0 %vm279_vm1, %v199_v5  ;;  %v2048_v4 = vpop.f32.mrb[1].mxu1  ;;  %v2584_v5 = vmax.f32 %v4395_v2, 0.0 }
 0x165   :  { %v2467_v11 = vmax.f32 %v1468_v10, 0.0  ;;  %4381 = vmatprep.mubr.msk.f32.mxu0 %vm279_vm1, %v200_v58 }
 0x167   :  { %v5891_v14 = vpack.c.bf16 %v2468_v9, %v2467_v11  ;;  %v4224_v15 = vpop.f32.mrb[72].mxu0 }
 0x168   :  { %v2470_v16 = vmax.f32 %v4224_v15, 0.0  ;;  %v1478_v17 = vpop.f32.mrb[73].mxu0  ;;  %4382 = vmatmul.mubr.msk.f32.gmra.mrb[178].mxu0 %vm279_vm1, %v201_v12  ;;  %v4398_v12 = vpop.f32.mrb[2].mxu1 }
 0x169   :  { %v2469_v18 = vmax.f32 %v1478_v17, 0.0  ;;  %4384 = vmatprep.mubr.msk.f32.mxu0 %vm279_vm1, %v202_v1  ;;  %v2058_v1 = vpop.f32.mrb[3].mxu1  ;;  %v2586_v15 = vmax.f32 %v4398_v12, 0.0 }
 0x16b   :  { %v5901_v21 = vpack.c.bf16 %v2470_v16, %v2469_v18  ;;  %v4227_v22 = vpop.f32.mrb[74].mxu0  ;;  %v2585_v16 = vmax.f32 %v2058_v1, 0.0 }
 0x16c   :  { %v2472_v23 = vmax.f32 %v4227_v22, 0.0  ;;  %v1488_v24 = vpop.f32.mrb[75].mxu0  ;;  %4385 = vmatmul.mubr.msk.f32.gmra.mrb[180].mxu0 %vm279_vm1, %v203_v19  ;;  %v4401_v22 = vpop.f32.mrb[4].mxu1 }
 0x16d   :  { %v2471_v25 = vmax.f32 %v1488_v24, 0.0  ;;  %4387 = vmatprep.mubr.msk.f32.mxu0 %vm279_vm1, %v204_v63  ;;  %v5929_v63 = vpack.c.bf16 %v2586_v15, %v2585_v16  ;;  %v2068_v24 = vpop.f32.mrb[5].mxu1 }
 0x16f   :  { %v5911_v28 = vpack.c.bf16 %v2472_v23, %v2471_v25  ;;  %v4230_v29 = vpop.f32.mrb[76].mxu0  ;;  %v2588_v25 = vmax.f32 %v4401_v22, 0.0 }
 0x170   :  { %v2474_v30 = vmax.f32 %v4230_v29, 0.0  ;;  %v1498_v31 = vpop.f32.mrb[77].mxu0  ;;  %4388 = vmatmul.mubr.msk.f32.gmra.mrb[182].mxu0 %vm279_vm1, %v205_v26  ;;  %v2587_v26 = vmax.f32 %v2068_v24, 0.0 }
 0x171   :  { %v2473_v32 = vmax.f32 %v1498_v31, 0.0  ;;  %4390 = vmatprep.mubr.msk.f32.mxu0 %vm279_vm1, %v206_v6 }
 0x172   :  { %v5932_v31 = vpack.c.bf16 %v2588_v25, %v2587_v26 }
 0x173   :  { %v5918_v13 = vpack.c.bf16 %v2474_v30, %v2473_v32  ;;  %v4233_v36 = vpop.f32.mrb[78].mxu0  ;;  %v4404_v32 = vpop.f32.mrb[6].mxu1 }
 0x174   :  { %v2476_v37 = vmax.f32 %v4233_v36, 0.0  ;;  %v1508_v38 = vpop.f32.mrb[79].mxu0  ;;  %4391 = vmatmul.mubr.msk.f32.gmra.mrb[184].mxu0 %vm279_vm1, %v207_v33  ;;  %v2078_v36 = vpop.f32.mrb[7].mxu1 }
 0x175   :  { %v2475_v40 = vmax.f32 %v1508_v38, 0.0  ;;  %v2589_v38 = vmax.f32 %v2078_v36, 0.0 }
 0x177   :  { %v5921_v42 = vpack.c.bf16 %v2476_v37, %v2475_v40  ;;  %v4236_v43 = vpop.f32.mrb[80].mxu0  ;;  %v2590_v37 = vmax.f32 %v4404_v32, 0.0 }
 0x178   :  { %v2478_v45 = vmax.f32 %v4236_v43, 0.0  ;;  %v1518_v49 = vpop.f32.mrb[81].mxu0 }
 0x179   :  { %v2477_v50 = vmax.f32 %v1518_v49, 0.0  ;;  %v5935_v49 = vpack.c.bf16 %v2590_v37, %v2589_v38 }
 0x17b   :  { %v4562_v52 = vpack.c.bf16 %v2478_v45, %v2477_v50  ;;  %v4239_v53 = vpop.f32.mrb[82].mxu0  ;;  %v4407_v50 = vpop.f32.mrb[8].mxu1 }
 0x17c   :  { %v2480_v54 = vmax.f32 %v4239_v53, 0.0  ;;  %v1528_v27 = vpop.f32.mrb[83].mxu0  ;;  %v6153_v53 = vsub.s32 4, %v5450_v35 }
 0x17d   :  { %v2479_v44 = vmax.f32 %v1528_v27, 0.0  ;;  %4563 = vmatprep.subr.bf16.mxu1 %v4562_v52  ;;  %v6152_v27 = vsub.s32 7, %v5450_v35 }
 0x17e   :  { %4565 = vmatpush3.bf16.msra.mxu1 %v5861_v57  ;;  %v2583_v57 = vmax.f32 %v2048_v4, 0.0 }
 0x17f   :  { %v4566_v55 = vpack.c.bf16 %v2480_v54, %v2479_v44  ;;  %v4242_v56 = vpop.f32.mrb[84].mxu0  ;;  %v2088_v54 = vpop.f32.mrb[9].mxu1  ;;  %v2592_v44 = vmax.f32 %v4407_v50, 0.0 }
 0x180   :  { %v2482_v59 = vmax.f32 %v4242_v56, 0.0  ;;  %v1538_v60 = vpop.f32.mrb[85].mxu0  ;;  %v5926_v11 = vpack.c.bf16 %v2584_v5, %v2583_v57 }
 0x181   :  { %v2481_v61 = vmax.f32 %v1538_v60, 0.0  ;;  %4567 = vmatprep.subr.bf16.mxu1 %v4566_v55 }
 0x182   :  { %4569 = vmatpush3.bf16.msra.mxu1 %v5871_v41 }
 0x183   :  { %v4570_v62 = vpack.c.bf16 %v2482_v59, %v2481_v61  ;;  %v4245_v47 = vpop.f32.mrb[86].mxu0 }
 0x184   :  { %v2484_v51 = vmax.f32 %v4245_v47, 0.0  ;;  %v1548_v0 = vpop.f32.mrb[87].mxu0 }
 0x185   :  { %v2483_v3 = vmax.f32 %v1548_v0, 0.0  ;;  %4571 = vmatprep.subr.bf16.mxu1 %v4570_v62  ;;  %v4410_v62 = vpop.f32.mrb[10].mxu1 }
 0x186   :  { %4573 = vmatpush3.bf16.msra.mxu1 %v5881_v7  ;;  %v2098_v0 = vpop.f32.mrb[11].mxu1 }
 0x187   :  { %v4574_v58 = vpack.c.bf16 %v2484_v51, %v2483_v3  ;;  %v4248_v8 = vpop.f32.mrb[88].mxu0  ;;  %v5945_v51 = vld [vmem:[%s6149_s2] sm:$0xff]  ;;  %v2594_v3 = vmax.f32 %v4410_v62, 0.0  ;;  %v2593_v4 = vmax.f32 %v2098_v0, 0.0 }
 0x188   :  { %v2486_v9 = vmax.f32 %v4248_v8, 0.0  ;;  %v1558_v10 = vpop.f32.mrb[89].mxu0  ;;  %v2688_v2 = vrot.slane %v5945_v51, %v6152_v27 }
 0x189   :  { %v2485_v41 = vmax.f32 %v1558_v10, 0.0  ;;  %4575 = vmatprep.subr.bf16.mxu1 %v4574_v58  ;;  %v4413_v10 = vpop.f32.mrb[12].mxu1 }
 0x18a   :  { %4577 = vmatpush3.bf16.msra.mxu1 %v5891_v14  ;;  %v2596_v1 = vmax.f32 %v4413_v10, 0.0 }
 0x18b   :  { %v4578_v17 = vpack.c.bf16 %v2486_v9, %v2485_v41  ;;  %v4251_v18 = vpop.f32.mrb[90].mxu0  ;;  %v5956_v9 = vpack.c.bf16 %v2594_v3, %v2593_v4  ;;  %v2108_v41 = vpop.f32.mrb[13].mxu1 }
 0x18c   :  { %v2488_v19 = vmax.f32 %v4251_v18, 0.0  ;;  %v1568_v7 = vpop.f32.mrb[91].mxu0 }
 0x18d   :  { %v2487_v23 = vmax.f32 %v1568_v7, 0.0  ;;  %4579 = vmatprep.subr.bf16.mxu1 %v4578_v17  ;;  %v4416_v7 = vpop.f32.mrb[14].mxu1 }
 0x18e   :  { %4581 = vmatpush3.bf16.msra.mxu1 %v5901_v21  ;;  %v2598_v24 = vmax.f32 %v4416_v7, 0.0 }
 0x18f   :  { %v4582_v6 = vpack.c.bf16 %v2488_v19, %v2487_v23  ;;  %v4254_v29 = vpop.f32.mrb[92].mxu0  ;;  %v2118_v23 = vpop.f32.mrb[15].mxu1 }
 0x190   :  { %v2490_v30 = vmax.f32 %v4254_v29, 0.0  ;;  %v1578_v14 = vpop.f32.mrb[93].mxu0  ;;  %v2597_v25 = vmax.f32 %v2118_v23, 0.0  ;;  %v4419_v32 = vpop.f32.mrb[16].mxu1 }
 0x191   :  { %v2489_v33 = vmax.f32 %v1578_v14, 0.0  ;;  %4583 = vmatprep.subr.bf16.mxu1 %v4582_v6  ;;  %v2128_v36 = vpop.f32.mrb[17].mxu1  ;;  %v2600_v37 = vmax.f32 %v4419_v32, 0.0 }
 0x192   :  { %4585 = vmatpush3.bf16.msra.mxu1 %v5911_v28  ;;  %v2591_v28 = vmax.f32 %v2088_v54, 0.0  ;;  %v5964_v14 = vpack.c.bf16 %v2598_v24, %v2597_v25  ;;  %v2599_v38 = vmax.f32 %v2128_v36, 0.0 }
 0x193   :  { %v4586_v40 = vpack.c.bf16 %v2490_v30, %v2489_v33  ;;  %v4257_v43 = vpop.f32.mrb[94].mxu0 }
 0x194   :  { %v2492_v45 = vmax.f32 %v4257_v43, 0.0  ;;  %v1588_v21 = vpop.f32.mrb[95].mxu0  ;;  %v5940_v61 = vpack.c.bf16 %v2592_v44, %v2591_v28  ;;  %v5968_v50 = vpack.c.bf16 %v2600_v37, %v2599_v38 }
 0x195   :  { %v2491_v52 = vmax.f32 %v1588_v21, 0.0  ;;  %4587 = vmatprep.subr.bf16.mxu1 %v4586_v40 }
 0x196   :  { %4589 = vmatpush3.bf16.msra.mxu1 %v5918_v13  ;;  %v2676_v13 = vrot.slane %v5945_v51, %v6153_v53 }
 0x197   :  { %v4590_v55 = vpack.c.bf16 %v2492_v45, %v2491_v52  ;;  %v4260_v56 = vpop.f32.mrb[96].mxu0  ;;  %v4422_v52 = vpop.f32.mrb[18].mxu1 }
 0x198   :  { %v2494_v59 = vmax.f32 %v4260_v56, 0.0  ;;  %v1598_v60 = vpop.f32.mrb[97].mxu0  ;;  %v2138_v44 = vpop.f32.mrb[19].mxu1  ;;  %v2602_v28 = vmax.f32 %v4422_v52, 0.0 }
 0x199   :  { %v2493_v47 = vmax.f32 %v1598_v60, 0.0  ;;  %4591 = vmatprep.subr.bf16.mxu1 %v4590_v55  ;;  %v2601_v55 = vmax.f32 %v2138_v44, 0.0 }
 0x19a   :  { %4593 = vmatpush3.bf16.msra.mxu1 %v5921_v42  ;;  %v2595_v42 = vmax.f32 %v2108_v41, 0.0 }
 0x19b   :  { %v5954_v5 = vpack.c.bf16 %v2494_v59, %v2493_v47  ;;  %v4263_v57 = vpop.f32.mrb[98].mxu0  ;;  %v5972_v47 = vpack.c.bf16 %v2602_v28, %v2601_v55 }
 0x19c   :  { %v2496_v58 = vmax.f32 %v4263_v57, 0.0  ;;  %v1608_v8 = vpop.f32.mrb[99].mxu0  ;;  %v5960_v19 = vpack.c.bf16 %v2596_v1, %v2595_v42 }
 0x19d   :  { %v2495_v12 = vmax.f32 %v1608_v8, 0.0  ;;  %2942 = vmatmul.mubr.f32.vlgmr.msra.gmra.mrb[74].mxu1 %v2676_v13  ;;  %v4425_v13 = vpop.f32.mrb[20].mxu1 }
 0x19e   :  { %3011 = vmatprep.mubr.f32.mxu1 %v2688_v2  ;;  %v2148_v2 = vpop.f32.mrb[21].mxu1  ;;  %v2604_v3 = vmax.f32 %v4425_v13, 0.0 }
 0x19f   :  { %v5958_v15 = vpack.c.bf16 %v2496_v58, %v2495_v12  ;;  %v4266_v16 = vpop.f32.mrb[100].mxu0  ;;  %v2603_v4 = vmax.f32 %v2148_v2, 0.0  ;;  %v4428_v41 = vpop.f32.mrb[22].mxu1 }
 0x1a0   :  { %v2498_v17 = vmax.f32 %v4266_v16, 0.0  ;;  %v1618_v18 = vpop.f32.mrb[101].mxu0  ;;  %v2158_v42 = vpop.f32.mrb[23].mxu1  ;;  %v2606_v16 = vmax.f32 %v4428_v41, 0.0 }
 0x1a1   :  { %v2497_v22 = vmax.f32 %v1618_v18, 0.0  ;;  %v5976_v12 = vpack.c.bf16 %v2604_v3, %v2603_v4  ;;  %v4431_v25 = vpop.f32.mrb[24].mxu1 }
 0x1a3   :  { %v5962_v26 = vpack.c.bf16 %v2498_v17, %v2497_v22  ;;  %v4269_v6 = vpop.f32.mrb[102].mxu0  ;;  %v2605_v17 = vmax.f32 %v2158_v42, 0.0 }
 0x1a4   :  { %v2500_v29 = vmax.f32 %v4269_v6, 0.0  ;;  %v1628_v30 = vpop.f32.mrb[103].mxu0 }
 0x1a5   :  { %v2499_v33 = vmax.f32 %v1628_v30, 0.0  ;;  %v5980_v24 = vpack.c.bf16 %v2606_v16, %v2605_v17  ;;  %v2608_v30 = vmax.f32 %v4431_v25, 0.0 }
 0x1a7   :  { %v5966_v40 = vpack.c.bf16 %v2500_v29, %v2499_v33  ;;  %v4272_v43 = vpop.f32.mrb[104].mxu0  ;;  %v2168_v29 = vpop.f32.mrb[25].mxu1 }
 0x1a8   :  { %v2502_v45 = vmax.f32 %v4272_v43, 0.0  ;;  %v1638_v21 = vpop.f32.mrb[105].mxu0  ;;  %v2607_v32 = vmax.f32 %v2168_v29, 0.0 }
 0x1a9   :  { %v2501_v54 = vmax.f32 %v1638_v21, 0.0 }
 0x1aa   :  { %v5984_v43 = vpack.c.bf16 %v2608_v30, %v2607_v32 }
 0x1ab   :  { %v5970_v56 = vpack.c.bf16 %v2502_v45, %v2501_v54  ;;  %v4275_v59 = vpop.f32.mrb[106].mxu0  ;;  %v4434_v45 = vpop.f32.mrb[26].mxu1 }
 0x1ac   :  { %v2504_v60 = vmax.f32 %v4275_v59, 0.0  ;;  %v1648_v62 = vpop.f32.mrb[107].mxu0  ;;  %v2178_v52 = vpop.f32.mrb[27].mxu1  ;;  %v2610_v54 = vmax.f32 %v4434_v45, 0.0 }
 0x1ad   :  { %v2503_v0 = vmax.f32 %v1648_v62, 0.0  ;;  %v2609_v44 = vmax.f32 %v2178_v52, 0.0  ;;  %v4437_v13 = vpop.f32.mrb[28].mxu1 }
 0x1ae   :  { %v2188_v2 = vpop.f32.mrb[29].mxu1  ;;  %v2612_v3 = vmax.f32 %v4437_v13, 0.0 }
 0x1af   :  { %v5974_v57 = vpack.c.bf16 %v2504_v60, %v2503_v0  ;;  %v4278_v58 = vpop.f32.mrb[108].mxu0  ;;  %v5986_v62 = vpack.c.bf16 %v2610_v54, %v2609_v44  ;;  %v2611_v4 = vmax.f32 %v2188_v2, 0.0  ;;  %v4440_v42 = vpop.f32.mrb[30].mxu1 }
 0x1b0   :  { %v2506_v8 = vmax.f32 %v4278_v58, 0.0  ;;  %v1658_v10 = vpop.f32.mrb[109].mxu0  ;;  %v2198_v17 = vpop.f32.mrb[31].mxu1 }
 0x1b1   :  { %v2505_v1 = vmax.f32 %v1658_v10, 0.0  ;;  %v4443_v30 = vpop.f32.mrb[32].mxu1 }
 0x1b3   :  { %v5978_v18 = vpack.c.bf16 %v2506_v8, %v2505_v1  ;;  %v4281_v7 = vpop.f32.mrb[110].mxu0  ;;  %v5989_v1 = vpack.c.bf16 %v2612_v3, %v2611_v4 }
 0x1b4   :  { %v2508_v22 = vmax.f32 %v4281_v7, 0.0  ;;  %v1668_v23 = vpop.f32.mrb[111].mxu0  ;;  %v2614_v7 = vmax.f32 %v4440_v42, 0.0 }
 0x1b5   :  { %v2507_v6 = vmax.f32 %v1668_v23, 0.0 }
 0x1b7   :  { %v5982_v33 = vpack.c.bf16 %v2508_v22, %v2507_v6  ;;  %v4284_v36 = vpop.f32.mrb[112].mxu0  ;;  %v2613_v22 = vmax.f32 %v2198_v17, 0.0 }
 0x1b8   :  { %v2510_v37 = vmax.f32 %v4284_v36, 0.0  ;;  %v1678_v38 = vpop.f32.mrb[113].mxu0  ;;  %v2208_v36 = vpop.f32.mrb[33].mxu1 }
 0x1b9   :  { %v2509_v21 = vmax.f32 %v1678_v38, 0.0  ;;  %v5992_v29 = vpack.c.bf16 %v2614_v7, %v2613_v22  ;;  %v2615_v38 = vmax.f32 %v2208_v36, 0.0  ;;  %v4446_v44 = vpop.f32.mrb[34].mxu1 }
 0x1bb   :  { %v4594_v28 = vpack.c.bf16 %v2510_v37, %v2509_v21  ;;  %v4287_v55 = vpop.f32.mrb[114].mxu0  ;;  %v2616_v37 = vmax.f32 %v4443_v30, 0.0 }
 0x1bc   :  { %v2512_v59 = vmax.f32 %v4287_v55, 0.0  ;;  %v1688_v60 = vpop.f32.mrb[115].mxu0  ;;  %v2218_v55 = vpop.f32.mrb[35].mxu1 }
 0x1bd   :  { %v2511_v0 = vmax.f32 %v1688_v60, 0.0  ;;  %4595 = vmatprep.subr.bf16.mxu1 %v4594_v28  ;;  %v5995_v54 = vpack.c.bf16 %v2616_v37, %v2615_v38  ;;  %v2617_v60 = vmax.f32 %v2218_v55, 0.0  ;;  %v4449_v2 = vpop.f32.mrb[36].mxu1 }
 0x1be   :  { %4597 = vmatpush3.bf16.msra.mxu1 %v5954_v5 }
 0x1bf   :  { %v4598_v58 = vpack.c.bf16 %v2512_v59, %v2511_v0  ;;  %v4290_v8 = vpop.f32.mrb[116].mxu0  ;;  %v2618_v59 = vmax.f32 %v4446_v44, 0.0 }
 0x1c0   :  { %v2514_v10 = vmax.f32 %v4290_v8, 0.0  ;;  %v1698_v41 = vpop.f32.mrb[117].mxu0  ;;  %v2228_v8 = vpop.f32.mrb[37].mxu1 }
 0x1c1   :  { %v2513_v16 = vmax.f32 %v1698_v41, 0.0  ;;  %4599 = vmatprep.subr.bf16.mxu1 %v4598_v58  ;;  %v5998_v4 = vpack.c.bf16 %v2618_v59, %v2617_v60  ;;  %v2620_v58 = vmax.f32 %v4449_v2, 0.0  ;;  %v2619_v41 = vmax.f32 %v2228_v8, 0.0 }
 0x1c2   :  { %4601 = vmatpush3.bf16.msra.mxu1 %v5958_v15 }
 0x1c3   :  { %v4602_v23 = vpack.c.bf16 %v2514_v10, %v2513_v16  ;;  %v4293_v25 = vpop.f32.mrb[118].mxu0  ;;  %v6001_v17 = vpack.c.bf16 %v2620_v58, %v2619_v41 }
 0x1c4   :  { %v2516_v6 = vmax.f32 %v4293_v25, 0.0  ;;  %v1708_v5 = vpop.f32.mrb[119].mxu0 }
 0x1c5   :  { %v2515_v32 = vmax.f32 %v1708_v5, 0.0  ;;  %4603 = vmatprep.subr.bf16.mxu1 %v4602_v23 }
 0x1c6   :  { %4605 = vmatpush3.bf16.msra.mxu1 %v5962_v26 }
 0x1c7   :  { %v4606_v45 = vpack.c.bf16 %v2516_v6, %v2515_v32  ;;  %v4296_v21 = vpop.f32.mrb[120].mxu0 }
 0x1c8   :  { %v2518_v52 = vmax.f32 %v4296_v21, 0.0  ;;  %v1718_v15 = vpop.f32.mrb[121].mxu0 }
 0x1c9   :  { %v2517_v28 = vmax.f32 %v1718_v15, 0.0  ;;  %4607 = vmatprep.subr.bf16.mxu1 %v4606_v45  ;;  %v6151_v15 = vsub.s32 6, %v5450_v35 }
 0x1ca   :  { %4609 = vmatpush3.bf16.msra.mxu1 %v5966_v40  ;;  %v4452_v40 = vpop.f32.mrb[38].mxu1 }
 0x1cb   :  { %v4610_v13 = vpack.c.bf16 %v2518_v52, %v2517_v28  ;;  %v4299_v0 = vpop.f32.mrb[122].mxu0  ;;  %v2622_v23 = vmax.f32 %v4452_v40, 0.0  ;;  %v2238_v25 = vpop.f32.mrb[39].mxu1 }
 0x1cc   :  { %v2520_v26 = vmax.f32 %v4299_v0, 0.0  ;;  %v1728_v3 = vpop.f32.mrb[123].mxu0  ;;  %v2621_v5 = vmax.f32 %v2238_v25, 0.0  ;;  %v4455_v37 = vpop.f32.mrb[40].mxu1 }
 0x1cd   :  { %v2519_v10 = vmax.f32 %v1728_v3, 0.0  ;;  %4611 = vmatprep.subr.bf16.mxu1 %v4610_v13  ;;  %v2624_v45 = vmax.f32 %v4455_v37, 0.0  ;;  %v2248_v21 = vpop.f32.mrb[41].mxu1 }
 0x1ce   :  { %4613 = vmatpush3.bf16.msra.mxu1 %v5970_v56  ;;  %v6004_v36 = vpack.c.bf16 %v2622_v23, %v2621_v5  ;;  %v2623_v44 = vmax.f32 %v2248_v21, 0.0  ;;  %v4458_v60 = vpop.f32.mrb[42].mxu1 }
 0x1cf   :  { %v4614_v42 = vpack.c.bf16 %v2520_v26, %v2519_v10  ;;  %v4302_v16 = vpop.f32.mrb[124].mxu0  ;;  %v2626_v2 = vmax.f32 %v4458_v60, 0.0  ;;  %v2258_v26 = vpop.f32.mrb[43].mxu1 }
 0x1d0   :  { %v2522_v7 = vmax.f32 %v4302_v16, 0.0  ;;  %v1738_v22 = vpop.f32.mrb[125].mxu0  ;;  %v6013_v59 = vpack.c.bf16 %v2624_v45, %v2623_v44  ;;  %v2625_v58 = vmax.f32 %v2258_v26, 0.0  ;;  %v4461_v16 = vpop.f32.mrb[44].mxu1 }
 0x1d1   :  { %v2521_v6 = vmax.f32 %v1738_v22, 0.0  ;;  %4615 = vmatprep.subr.bf16.mxu1 %v4614_v42  ;;  %v2628_v22 = vmax.f32 %v4461_v16, 0.0  ;;  %v2268_v23 = vpop.f32.mrb[45].mxu1 }
 0x1d2   :  { %4617 = vmatpush3.bf16.msra.mxu1 %v5974_v57  ;;  %v6011_v57 = vld [vmem:[%s6149_s2 + $0x8] sm:$0xff]  ;;  %v6024_v42 = vpack.c.bf16 %v2626_v2, %v2625_v58  ;;  %s4784_s2 = smov [#allocation2]  }
 0x1d3   :  { %v4618_v30 = vpack.c.bf16 %v2522_v7, %v2521_v6  ;;  %v4305_v32 = vpop.f32.mrb[126].mxu0  ;;  %v2696_v8 = vrot.slane %v6011_v57, %v2663_v39  ;;  %v4464_v39 = vpop.f32.mrb[46].mxu1  ;;  %s3310_s26 = sshll.u32 %s4784_s2, 4  ;;  %s3311_s26 = int_to_ptr.vmem [resolvable:$true] %s3310_s26 }
 0x1d4   :  { %v2524_v56 = vmax.f32 %v4305_v32, 0.0  ;;  %v1748_v38 = vpop.f32.mrb[127].mxu0  ;;  %v2630_v37 = vmax.f32 %v4464_v39, 0.0  ;;  %s4759_s27 = scalar_lea.vmem %s3311_s26, 16  ;;  %s4763_s28 = scalar_lea.vmem %s3311_s26, 32 }
 0x1d5   :  { %v2523_v52 = vmax.f32 %v1748_v38, 0.0  ;;  %4619 = vmatprep.subr.bf16.mxu1 %v4618_v30  ;;  %p4760_p0 = scmp.ne.s32.totalorder %s3311_s26, %s4759_s27  ;;  %p4764_p1 = scmp.lt.s32.totalorder %s3311_s26, %s3311_s26 }
 0x1d6   :  { %4621 = vmatpush3.bf16.msra.mxu1 %v5978_v18  ;;  %v2684_v18 = vrot.slane %v5945_v51, %v6151_v15  ;;  %v2627_v51 = vmax.f32 %v2268_v23, 0.0  ;;  %p4765_p2 = scmp.lt.s32.totalorder %s4763_s28, %s4759_s27 }
 0x1d7   :  { %v4622_v28 = vpack.c.bf16 %v2524_v56, %v2523_v52  ;;  %v4308_v55 = vpop.f32.mrb[128].mxu0  ;;  %v2278_v56 = vpop.f32.mrb[47].mxu1 }
 0x1d8   :  { %v2526_v13 = vmax.f32 %v4308_v55, 0.0  ;;  %v1758_v0 = vpop.f32.mrb[129].mxu0  ;;  %v6028_v5 = vpack.c.bf16 %v2628_v22, %v2627_v51  ;;  %v2629_v45 = vmax.f32 %v2278_v56, 0.0  ;;  %p4766_p3 = por %p4765_p2, %p4764_p1 }
 0x1d9   :  { %v2525_v3 = vmax.f32 %v1758_v0, 0.0  ;;  %4623 = vmatprep.subr.bf16.mxu1 %v4622_v28  ;;  %v4467_v28 = vpop.f32.mrb[48].mxu1 }
 0x1da   :  { %4625 = vmatpush3.bf16.msra.mxu1 %v5982_v33  ;;  %v6032_v44 = vpack.c.bf16 %v2630_v37, %v2629_v45  ;;  %v2288_v0 = vpop.f32.mrb[49].mxu1  ;;  %p4767_p4 = pnand %p4766_p3, %p4760_p0 }
 0x1db   :  { %v6022_v10 = vpack.c.bf16 %v2526_v13, %v2525_v3  ;;  %v4311_v41 = vpop.f32.mrb[130].mxu0  ;;  %v2632_v13 = vmax.f32 %v4467_v28, 0.0  ;;  %v2631_v26 = vmax.f32 %v2288_v0, 0.0 }
 0x1dc   :  { %v2528_v40 = vmax.f32 %v4311_v41, 0.0  ;;  %v1768_v7 = vpop.f32.mrb[131].mxu0 }
 0x1dd   :  { %v2527_v25 = vmax.f32 %v1768_v7, 0.0  ;;  %3012 = vmatmul.mubr.f32.vlgmr.msra.gmra.mrb[76].mxu1 %v2684_v18  ;;  %v6036_v58 = vpack.c.bf16 %v2632_v13, %v2631_v26 }
 0x1de   :  { %3081 = vmatprep.mubr.f32.mxu1 %v2696_v8  ;;  %v4470_v8 = vpop.f32.mrb[50].mxu1 }
 0x1df   :  { %v6026_v6 = vpack.c.bf16 %v2528_v40, %v2527_v25  ;;  %v4314_v33 = vpop.f32.mrb[132].mxu0  ;;  %v2634_v40 = vmax.f32 %v4470_v8, 0.0  ;;  %v2298_v7 = vpop.f32.mrb[51].mxu1 }
 0x1e0   :  { %v2530_v30 = vmax.f32 %v4314_v33, 0.0  ;;  %v1778_v32 = vpop.f32.mrb[133].mxu0  ;;  %v2633_v23 = vmax.f32 %v2298_v7, 0.0  ;;  %v4473_v39 = vpop.f32.mrb[52].mxu1 }
 0x1e1   :  { %v2529_v38 = vmax.f32 %v1778_v32, 0.0  ;;  %v2636_v37 = vmax.f32 %v4473_v39, 0.0  ;;  %v2308_v56 = vpop.f32.mrb[53].mxu1 }
 0x1e2   :  { %v6040_v33 = vpack.c.bf16 %v2634_v40, %v2633_v23  ;;  %v2635_v45 = vmax.f32 %v2308_v56, 0.0 }
 0x1e3   :  { %v6030_v21 = vpack.c.bf16 %v2530_v30, %v2529_v38  ;;  %v4317_v52 = vpop.f32.mrb[134].mxu0 }
 0x1e4   :  { %v2532_v55 = vmax.f32 %v4317_v52, 0.0  ;;  %v1788_v60 = vpop.f32.mrb[135].mxu0 }
 0x1e5   :  { %v2531_v2 = vmax.f32 %v1788_v60, 0.0  ;;  %v4476_v60 = vpop.f32.mrb[54].mxu1 }
 0x1e6   :  { %v2318_v26 = vpop.f32.mrb[55].mxu1 }
 0x1e7   :  { %v6034_v3 = vpack.c.bf16 %v2532_v55, %v2531_v2  ;;  %v4320_v18 = vpop.f32.mrb[136].mxu0  ;;  %v6044_v55 = vpack.c.bf16 %v2636_v37, %v2635_v45  ;;  %v2638_v2 = vmax.f32 %v4476_v60, 0.0  ;;  %v2637_v8 = vmax.f32 %v2318_v26, 0.0  ;;  %v4479_v7 = vpop.f32.mrb[56].mxu1 }
 0x1e8   :  { %v2534_v41 = vmax.f32 %v4320_v18, 0.0  ;;  %v1798_v16 = vpop.f32.mrb[137].mxu0  ;;  %v2328_v39 = vpop.f32.mrb[57].mxu1 }
 0x1e9   :  { %v2533_v22 = vmax.f32 %v1798_v16, 0.0  ;;  %6156 = vst [vmem:[#allocation5_spill] sm:$0xff] %v6044_v55  ;;  %v6048_v40 = vpack.c.bf16 %v2638_v2, %v2637_v8  ;;  %v4482_v45 = vpop.f32.mrb[58].mxu1 }
 0x1eb   :  { %v6038_v25 = vpack.c.bf16 %v2534_v41, %v2533_v22  ;;  %v4323_v51 = vpop.f32.mrb[138].mxu0 }
 0x1ec   :  { %v2536_v30 = vmax.f32 %v4323_v51, 0.0  ;;  %v1808_v32 = vpop.f32.mrb[139].mxu0  ;;  %v2640_v51 = vmax.f32 %v4479_v7, 0.0 }
 0x1ed   :  { %v2535_v38 = vmax.f32 %v1808_v32, 0.0  ;;  %v2639_v32 = vmax.f32 %v2328_v39, 0.0 }
 0x1ef   :  { %v6042_v52 = vpack.c.bf16 %v2536_v30, %v2535_v38  ;;  %v4326_v28 = vpop.f32.mrb[140].mxu0  ;;  %v6052_v38 = vpack.c.bf16 %v2640_v51, %v2639_v32 }
 0x1f0   :  { %v2538_v13 = vmax.f32 %v4326_v28, 0.0  ;;  %v1818_v0 = vpop.f32.mrb[141].mxu0 }
 0x1f1   :  { %v2537_v18 = vmax.f32 %v1818_v0, 0.0  ;;  %v2338_v0 = vpop.f32.mrb[59].mxu1 }
 0x1f2   :  { %v2641_v2 = vmax.f32 %v2338_v0, 0.0  ;;  %v4485_v7 = vpop.f32.mrb[60].mxu1 }
 0x1f3   :  { %v6046_v41 = vpack.c.bf16 %v2538_v13, %v2537_v18  ;;  %v4329_v16 = vpop.f32.mrb[142].mxu0  ;;  %v2642_v13 = vmax.f32 %v4482_v45, 0.0  ;;  %v2644_v39 = vmax.f32 %v4485_v7, 0.0 }
 0x1f4   :  { %v2540_v22 = vmax.f32 %v4329_v16, 0.0  ;;  %v1828_v23 = vpop.f32.mrb[143].mxu0 }
 0x1f5   :  { %v2539_v30 = vmax.f32 %v1828_v23, 0.0  ;;  %v6054_v16 = vpack.c.bf16 %v2642_v13, %v2641_v2 }
 0x1f7   :  { %v6050_v37 = vpack.c.bf16 %v2540_v22, %v2539_v30  ;;  %v4332_v56 = vpop.f32.mrb[144].mxu0  ;;  %v2348_v22 = vpop.f32.mrb[61].mxu1 }
 0x1f8   :  { %v2542_v28 = vmax.f32 %v4332_v56, 0.0  ;;  %v1838_v60 = vpop.f32.mrb[145].mxu0  ;;  %v2643_v51 = vmax.f32 %v2348_v22, 0.0 }
 0x1f9   :  { %v2541_v26 = vmax.f32 %v1838_v60, 0.0  ;;  %v4488_v60 = vpop.f32.mrb[62].mxu1 }
 0x1fa   :  { %v6057_v45 = vpack.c.bf16 %v2644_v39, %v2643_v51  ;;  %v2358_v13 = vpop.f32.mrb[63].mxu1 }
 0x1fb   :  { %v4626_v18 = vpack.c.bf16 %v2542_v28, %v2541_v26  ;;  %v4335_v8 = vpop.f32.mrb[146].mxu0  ;;  %v2646_v26 = vmax.f32 %v4488_v60, 0.0  ;;  %v4491_v22 = vpop.f32.mrb[64].mxu1 }
 0x1fc   :  { %v2544_v15 = vmax.f32 %v4335_v8, 0.0  ;;  %v1848_v23 = vpop.f32.mrb[147].mxu0  ;;  %v2645_v8 = vmax.f32 %v2358_v13, 0.0  ;;  %v2368_v39 = vpop.f32.mrb[65].mxu1 }
 0x1fd   :  { %v2543_v30 = vmax.f32 %v1848_v23, 0.0  ;;  %4627 = vmatprep.subr.bf16.mxu1 %v4626_v18  ;;  %v4494_v13 = vpop.f32.mrb[66].mxu1 }
 0x1fe   :  { %4629 = vmatpush3.bf16.msra.mxu1 %v6022_v10  ;;  %v6060_v18 = vpack.c.bf16 %v2646_v26, %v2645_v8  ;;  %v2378_v26 = vpop.f32.mrb[67].mxu1 }
 0x1ff   :  { %v4630_v32 = vpack.c.bf16 %v2544_v15, %v2543_v30  ;;  %v4338_v56 = vpop.f32.mrb[148].mxu0  ;;  %v2648_v30 = vmax.f32 %v4491_v22, 0.0 }
 0x200   :  { %v2546_v0 = vmax.f32 %v4338_v56, 0.0  ;;  %v1858_v28 = vpop.f32.mrb[149].mxu0  ;;  %v2647_v56 = vmax.f32 %v2368_v39, 0.0  ;;  %v4497_v39 = vpop.f32.mrb[68].mxu1 }
 0x201   :  { %v2545_v2 = vmax.f32 %v1858_v28, 0.0  ;;  %4631 = vmatprep.subr.bf16.mxu1 %v4630_v32 }
 0x202   :  { %4633 = vmatpush3.bf16.msra.mxu1 %v6026_v6  ;;  %v6063_v32 = vpack.c.bf16 %v2648_v30, %v2647_v56  ;;  %v2388_v30 = vpop.f32.mrb[69].mxu1 }
 0x203   :  { %v4634_v7 = vpack.c.bf16 %v2546_v0, %v2545_v2  ;;  %v4341_v23 = vpop.f32.mrb[150].mxu0  ;;  %v2650_v2 = vmax.f32 %v4494_v13, 0.0  ;;  %v3864_v27 = vpop.f32.mrb[70].mxu1 }
 0x204   :  { %v2548_v10 = vmax.f32 %v4341_v23, 0.0  ;;  %v1868_v15 = vpop.f32.mrb[151].mxu0  ;;  %v2649_v23 = vmax.f32 %v2378_v26, 0.0  ;;  %v3865_v13 = vpop.f32.mrb[71].mxu1 }
 0x205   :  { %v2547_v51 = vmax.f32 %v1868_v15, 0.0  ;;  %4635 = vmatprep.subr.bf16.mxu1 %v4634_v7 }
 0x206   :  { %4637 = vmatpush3.bf16.msra.mxu1 %v6030_v21  ;;  %v6066_v7 = vpack.c.bf16 %v2650_v2, %v2649_v23 }
 0x207   :  { %v4638_v60 = vpack.c.bf16 %v2548_v10, %v2547_v51  ;;  %v4344_v28 = vpop.f32.mrb[152].mxu0  ;;  %v2652_v51 = vmax.f32 %v4497_v39, 0.0 }
 0x208   :  { %v2550_v6 = vmax.f32 %v4344_v28, 0.0  ;;  %v1878_v0 = vpop.f32.mrb[153].mxu0  ;;  %v2651_v28 = vmax.f32 %v2388_v30, 0.0 }
 0x209   :  { %v2549_v8 = vmax.f32 %v1878_v0, 0.0  ;;  %4639 = vmatprep.subr.bf16.mxu1 %v4638_v60 }
 0x20a   :  { %4641 = vmatpush3.bf16.msra.mxu1 %v6034_v3  ;;  %v6069_v26 = vpack.c.bf16 %v2652_v51, %v2651_v28  ;;  %v3866_v3 = vadd.f32 %v3865_v13, %v3864_v27  ;;  %v2692_v27 = vrot.slane %v6011_v57, %v2659_v34 }
 0x20b   :  { %v4642_v22 = vpack.c.bf16 %v2550_v6, %v2549_v8  ;;  %v4347_v15 = vpop.f32.mrb[154].mxu0 }
 0x20c   :  { %v2552_v21 = vmax.f32 %v4347_v15, 0.0  ;;  %v1888_v10 = vpop.f32.mrb[155].mxu0  ;;  %6157 = vst [vmem:[#allocation6_spill] sm:$0xff] %v6069_v26 }
 0x20d   :  { %v2551_v56 = vmax.f32 %v1888_v10, 0.0  ;;  %4643 = vmatprep.subr.bf16.mxu1 %v4642_v22 }
 0x20e   :  { %4645 = vmatpush3.bf16.msra.mxu1 %v6038_v25 }
 0x20f   :  { %v4646_v60 = vpack.c.bf16 %v2552_v21, %v2551_v56  ;;  %v4350_v0 = vpop.f32.mrb[156].mxu0 }
 0x210   :  { %v2554_v6 = vmax.f32 %v4350_v0, 0.0  ;;  %v1898_v2 = vpop.f32.mrb[157].mxu0 }
 0x211   :  { %v2553_v8 = vmax.f32 %v1898_v2, 0.0  ;;  %4647 = vmatprep.subr.bf16.mxu1 %v4646_v60 }
 0x212   :  { %4649 = vmatpush3.bf16.msra.mxu1 %v6042_v52  ;;  %v2704_v52 = vrot.slane %v6011_v57, %v2671_v48 }
 0x213   :  { %v4650_v23 = vpack.c.bf16 %v2554_v6, %v2553_v8  ;;  %v4353_v15 = vpop.f32.mrb[158].mxu0 }
 0x214   :  { %v2556_v39 = vmax.f32 %v4353_v15, 0.0  ;;  %v1908_v22 = vpop.f32.mrb[159].mxu0 }
 0x215   :  { %v2555_v10 = vmax.f32 %v1908_v22, 0.0  ;;  %4651 = vmatprep.subr.bf16.mxu1 %v4650_v23 }
 0x216   :  { %4653 = vmatpush3.bf16.msra.mxu1 %v6046_v41 }
 0x217   :  { %v4654_v25 = vpack.c.bf16 %v2556_v39, %v2555_v10  ;;  %v4356_v21 = vpop.f32.mrb[160].mxu0 }
 0x218   :  { %v2558_v30 = vmax.f32 %v4356_v21, 0.0  ;;  %v1918_v51 = vpop.f32.mrb[161].mxu0 }
 0x219   :  { %v2557_v56 = vmax.f32 %v1918_v51, 0.0  ;;  %4655 = vmatprep.subr.bf16.mxu1 %v4654_v25 }
 0x21a   :  { %4657 = vmatpush3.bf16.msra.mxu1 %v6050_v37 }
 0x21b   :  { %v4660_v28 = vpack.c.bf16 %v2558_v30, %v2557_v56  ;;  %v4359_v13 = vpop.f32.mrb[162].mxu0 }
 0x21c   :  { %v2560_v60 = vmax.f32 %v4359_v13, 0.0  ;;  %v1928_v41 = vpop.f32.mrb[163].mxu0 }
 0x21d   :  { %v2559_v0 = vmax.f32 %v1928_v41, 0.0  ;;  %3082 = vmatmul.mubr.f32.vlgmr.msra.gmra.mrb[78].mxu1 %v2692_v27 }
 0x21e   :  { %3151 = vmatprep.mubr.f32.mxu1 %v2704_v52 }
 0x21f   :  { %v4664_v6 = vpack.c.bf16 %v2560_v60, %v2559_v0  ;;  %v4362_v2 = vpop.f32.mrb[164].mxu0 }
 0x220   :  { %v2562_v8 = vmax.f32 %v4362_v2, 0.0  ;;  %v1938_v23 = vpop.f32.mrb[165].mxu0 }
 0x221   :  { %v2561_v15 = vmax.f32 %v1938_v23, 0.0 }
 0x223   :  { %v4668_v39 = vpack.c.bf16 %v2562_v8, %v2561_v15  ;;  %v4365_v34 = vpop.f32.mrb[166].mxu0 }
 0x224   :  { %v2564_v22 = vmax.f32 %v4365_v34, 0.0  ;;  %v1948_v37 = vpop.f32.mrb[167].mxu0 }
 0x225   :  { %v2563_v10 = vmax.f32 %v1948_v37, 0.0 }
 0x227   :  { %v4672_v25 = vpack.c.bf16 %v2564_v22, %v2563_v10  ;;  %v4368_v21 = vpop.f32.mrb[168].mxu0 }
 0x228   :  { %v2566_v48 = vmax.f32 %v4368_v21, 0.0  ;;  %v1958_v30 = vpop.f32.mrb[169].mxu0 }
 0x229   :  { %v2565_v51 = vmax.f32 %v1958_v30, 0.0 }
 0x22b   :  { %v4676_v56 = vpack.c.bf16 %v2566_v48, %v2565_v51  ;;  %v4371_v13 = vpop.f32.mrb[170].mxu0 }
 0x22c   :  { %v2568_v41 = vmax.f32 %v4371_v13, 0.0  ;;  %v1968_v27 = vpop.f32.mrb[171].mxu0 }
 0x22d   :  { %v2567_v52 = vmax.f32 %v1968_v27, 0.0 }
 0x22f   :  { %v4680_v60 = vpack.c.bf16 %v2568_v41, %v2567_v52  ;;  %v4374_v0 = vpop.f32.mrb[172].mxu0 }
 0x230   :  { %v2570_v2 = vmax.f32 %v4374_v0, 0.0  ;;  %v1978_v53 = vpop.f32.mrb[173].mxu0  ;;  %v3899_v23 = vpop.f32.mrb[72].mxu1 }
 0x231   :  { %v2569_v8 = vmax.f32 %v1978_v53, 0.0  ;;  %v3900_v15 = vpop.f32.mrb[73].mxu1 }
 0x232   :  { %v3901_v34 = vadd.f32 %v3900_v15, %v3899_v23 }
 0x233   :  { %v4684_v46 = vpack.c.bf16 %v2570_v2, %v2569_v8  ;;  %v4377_v37 = vpop.f32.mrb[174].mxu0 }
 0x234   :  { %v2572_v22 = vmax.f32 %v4377_v37, 0.0  ;;  %v1988_v10 = vpop.f32.mrb[175].mxu0  ;;  %v6080_v21 = vadd.f32 %v3901_v34, %v3866_v3 }
 0x235   :  { %v2571_v30 = vmax.f32 %v1988_v10, 0.0 }
 0x237   :  { %v4688_v48 = vpack.c.bf16 %v2572_v22, %v2571_v30  ;;  %v4380_v51 = vpop.f32.mrb[176].mxu0 }
 0x238   :  { %v2574_v13 = vmax.f32 %v4380_v51, 0.0  ;;  %v1998_v20 = vpop.f32.mrb[177].mxu0 }
 0x239   :  { %v2573_v27 = vmax.f32 %v1998_v20, 0.0 }
 0x23b   :  { %v4658_v41 = vpack.c.bf16 %v2574_v13, %v2573_v27  ;;  %v4383_v52 = vpop.f32.mrb[178].mxu0 }
 0x23c   :  { %v2576_v0 = vmax.f32 %v4383_v52, 0.0  ;;  %v2008_v55 = vpop.f32.mrb[179].mxu0 }
 0x23d   :  { %v2575_v26 = vmax.f32 %v2008_v55, 0.0  ;;  %4659 = vmatprep.subr.bf16.mxu1 %v4658_v41 }
 0x23e   :  { %4661 = vmatpush3.bf16.msra.mxu1 %v4660_v28  ;;  %v6158_v28 = vsub.s32 2, %v5450_v35 }
 0x23f   :  { %v4662_v53 = vpack.c.bf16 %v2576_v0, %v2575_v26  ;;  %v4386_v2 = vpop.f32.mrb[180].mxu0 }
 0x240   :  { %v2578_v23 = vmax.f32 %v4386_v2, 0.0  ;;  %v2018_v8 = vpop.f32.mrb[181].mxu0 }
 0x241   :  { %v2577_v15 = vmax.f32 %v2018_v8, 0.0  ;;  %4663 = vmatprep.subr.bf16.mxu1 %v4662_v53 }
 0x242   :  { %4665 = vmatpush3.bf16.msra.mxu1 %v4664_v6  ;;  %v2700_v6 = vrot.slane %v6011_v57, %v6158_v28 }
 0x243   :  { %v4666_v3 = vpack.c.bf16 %v2578_v23, %v2577_v15  ;;  %v4389_v34 = vpop.f32.mrb[182].mxu0 }
 0x244   :  { %v2580_v37 = vmax.f32 %v4389_v34, 0.0  ;;  %v2028_v22 = vpop.f32.mrb[183].mxu0 }
 0x245   :  { %v2579_v10 = vmax.f32 %v2028_v22, 0.0  ;;  %4667 = vmatprep.subr.bf16.mxu1 %v4666_v3 }
 0x246   :  { %4669 = vmatpush3.bf16.msra.mxu1 %v4668_v39  ;;  %v6159_v39 = vsub.s32 5, %v5450_v35 }
 0x247   :  { %v4670_v20 = vpack.c.bf16 %v2580_v37, %v2579_v10  ;;  %v4392_v30 = vpop.f32.mrb[184].mxu0 }
 0x248   :  { %v2582_v51 = vmax.f32 %v4392_v30, 0.0  ;;  %v2038_v55 = vpop.f32.mrb[185].mxu0 }
 0x249   :  { %v2581_v13 = vmax.f32 %v2038_v55, 0.0  ;;  %4671 = vmatprep.subr.bf16.mxu1 %v4670_v20 }
 0x24a   :  { %4673 = vmatpush3.bf16.msra.mxu1 %v4672_v25  ;;  %v2712_v25 = vrot.slane %v6011_v57, %v6159_v39 }
 0x24b   :  { %v4674_v26 = vpack.c.bf16 %v2582_v51, %v2581_v13 }
 0x24d   :  { %4675 = vmatprep.subr.bf16.mxu1 %v4674_v26 }
 0x24e   :  { %4677 = vmatpush3.bf16.msra.mxu1 %v4676_v56 }
 0x24f   :  { %4679 = vmatprep.subr.bf16.mxu1 %v5926_v11 }
 0x252   :  { %4681 = vmatpush3.bf16.msra.mxu1 %v4680_v60 }
 0x253   :  { %4683 = vmatprep.subr.bf16.mxu1 %v5929_v63 }
 0x256   :  { %4685 = vmatpush3.bf16.msra.mxu1 %v4684_v46 }
 0x257   :  { %4687 = vmatprep.subr.bf16.mxu1 %v5932_v31 }
 0x25a   :  { %4689 = vmatpush3.bf16.msra.mxu1 %v4688_v48 }
 0x25b   :  { %4691 = vmatprep.subr.bf16.mxu1 %v5980_v24 }
 0x25d   :  { %3152 = vmatmul.mubr.f32.vlgmr.msra.gmra.mrb[80].mxu1 %v2700_v6 }
 0x25e   :  { %4693 = vmatpush3.bf16.msra.mxu1 %v5935_v49  ;;  %3221 = vmatprep.mubr.f32.mxu1 %v2712_v25  ;;  %v6160_v49 = vsub.s32 4, %v5450_v35 }
 0x25f   :  { %4695 = vmatprep.subr.bf16.mxu1 %v5984_v43 }
 0x262   :  { %4697 = vmatpush3.bf16.msra.mxu1 %v5940_v61  ;;  %v2708_v61 = vrot.slane %v6011_v57, %v6160_v49 }
 0x263   :  { %4699 = vmatprep.subr.bf16.mxu1 %v5986_v62 }
 0x266   :  { %4701 = vmatpush3.bf16.msra.mxu1 %v5956_v9  ;;  %v6161_v9 = vsub.s32 7, %v5450_v35 }
 0x267   :  { %4703 = vmatprep.subr.bf16.mxu1 %v5989_v1 }
 0x26a   :  { %4705 = vmatpush3.bf16.msra.mxu1 %v5960_v19  ;;  %v2720_v19 = vrot.slane %v6011_v57, %v6161_v9 }
 0x26b   :  { %4707 = vmatprep.subr.bf16.mxu1 %v5992_v29 }
 0x26e   :  { %4709 = vmatpush3.bf16.msra.mxu1 %v5964_v14  ;;  %v6162_v14 = vld [vmem:[#allocation6_spill] sm:$0xff] }
 0x26f   :  { %4711 = vmatprep.subr.bf16.mxu1 %v5995_v54 }
 0x270   :  { %v3934_v46 = vpop.f32.mrb[74].mxu1 }
 0x271   :  { %v3935_v11 = vpop.f32.mrb[75].mxu1 }
 0x272   :  { %4713 = vmatpush3.bf16.msra.mxu1 %v5968_v50  ;;  %v3936_v63 = vadd.f32 %v3935_v11, %v3934_v46  ;;  %v6163_v50 = vsub.s32 6, %v5450_v35 }
 0x273   :  { %4715 = vmatprep.subr.bf16.mxu1 %v5998_v4 }
 0x274   :  { %v2944_v31 = vadd.f32 %v3936_v63, %v6080_v21 }
 0x276   :  { %4717 = vmatpush3.bf16.msra.mxu1 %v5972_v47  ;;  %v2716_v47 = vrot.slane %v6011_v57, %v6163_v50 }
 0x277   :  { %4719 = vmatprep.subr.bf16.mxu1 %v6001_v17 }
 0x27a   :  { %4721 = vmatpush3.bf16.msra.mxu1 %v5976_v12  ;;  %v6164_v12 = vld [vmem:[#allocation5_spill] sm:$0xff] }
 0x27b   :  { %4723 = vmatprep.subr.bf16.mxu1 %v6048_v40 }
 0x27d   :  { %3222 = vmatmul.mubr.f32.vlgmr.msra.gmra.mrb[82].mxu1 %v2708_v61 }
 0x27e   :  { %4725 = vmatpush3.bf16.msra.mxu1 %v6004_v36  ;;  %3291 = vmatprep.mubr.f32.mxu1 %v2720_v19  ;;  %v4783_v36 = vmov 0.0  }
 0x27f   :  { %4727 = vmatprep.subr.bf16.mxu1 %v6052_v38  ;;  %20 = vst.msk [vmem:[#allocation2] sm:$0x1] %vm19_vm2, %v4783_v36 }
 0x282   :  { %4729 = vmatpush3.bf16.msra.mxu1 %v6013_v59 }
 0x283   :  { %4731 = vmatprep.subr.bf16.mxu1 %v6054_v16 }
 0x286   :  { %4733 = vmatpush3.bf16.msra.mxu1 %v6024_v42 }
 0x287   :  { %4735 = vmatprep.subr.bf16.mxu1 %v6057_v45 }
 0x28a   :  { %4737 = vmatpush3.bf16.msra.mxu1 %v6028_v5 }
 0x28b   :  { %4739 = vmatprep.subr.bf16.mxu1 %v6060_v18 }
 0x28e   :  { %4741 = vmatpush3.bf16.msra.mxu1 %v6032_v44 }
 0x28f   :  { %4743 = vmatprep.subr.bf16.mxu1 %v6063_v32  ;;  %v21_v32 = vld [vmem:[#allocation2] sm:$0x1] }
 0x292   :  { %4745 = vmatpush3.bf16.msra.mxu1 %v6036_v58 }
 0x293   :  { %4747 = vmatprep.subr.bf16.mxu1 %v6066_v7 }
 0x296   :  { %4749 = vmatpush3.bf16.msra.mxu1 %v6040_v33 }
 0x297   :  { %4751 = vmatprep.subr.bf16.mxu1 %v6162_v14 }
 0x29a   :  { %4753 = vmatpush3.bf16.msra.mxu1 %v6164_v12 }
 0x29d   :  { %3292 = vmatmul.mubr.f32.vlgmr.msra.gmra.mrb[84].mxu1 %v2716_v47 }
 0x2b0   :  { %v3969_v24 = vpop.f32.mrb[76].mxu1 }
 0x2b1   :  { %v3970_v43 = vpop.f32.mrb[77].mxu1 }
 0x2b2   :  { %v3971_v62 = vadd.f32 %v3970_v43, %v3969_v24 }
 0x2b4   :  { %v3014_v1 = vadd.f32 %v3971_v62, %v2944_v31 }
 0x2f0   :  { %v4004_v29 = vpop.f32.mrb[78].mxu1 }
 0x2f1   :  { %v4005_v54 = vpop.f32.mrb[79].mxu1 }
 0x2f2   :  { %v4006_v4 = vadd.f32 %v4005_v54, %v4004_v29 }
 0x2f4   :  { %v3084_v17 = vadd.f32 %v4006_v4, %v3014_v1 }
 0x330   :  { %v4039_v59 = vpop.f32.mrb[80].mxu1 }
 0x331   :  { %v4040_v42 = vpop.f32.mrb[81].mxu1 }
 0x332   :  { %v4041_v35 = vadd.f32 %v4040_v42, %v4039_v59 }
 0x334   :  { %v3154_v5 = vadd.f32 %v4041_v35, %v3084_v17 }
 0x350   :  { %v4074_v57 = vpop.f32.mrb[82].mxu1 }
 0x351   :  { %v4075_v44 = vpop.f32.mrb[83].mxu1 }
 0x352   :  { %v4076_v58 = vadd.f32 %v4075_v44, %v4074_v57 }
 0x354   :  { %v3224_v33 = vadd.f32 %v4076_v58, %v3154_v5 }
 0x370   :  { %v4109_v40 = vpop.f32.mrb[84].mxu1 }
 0x371   :  { %v4110_v38 = vpop.f32.mrb[85].mxu1 }
 0x372   :  { %v4111_v16 = vadd.f32 %v4110_v38, %v4109_v40 }
 0x374   :  { %v3294_v45 = vadd.f32 %v4111_v16, %v3224_v33 }
 0x376   :  { %v3298_v18 = vsel %vm3297_vm3, %v3294_v45, 0.0 }
 0x377   :  { %3299 = vadd.xlane.f32.xlu0 %v3298_v18 }
 0x404   :  { %v3300_v7 = vpop.xlane.xlu0 %3299 }
 0x405   :  { %v3301_v56 = vadd.f32 %v3300_v7, %v21_v32 }
 0x407   :  { %3303 = vst.msk [vmem:[#allocation2] sm:$0x1] %vm19_vm2, %v3301_v56 }
 0x408   :  { %4770 = shalt.err (!%p4767_p4)
}
 0x409   :  { %s4771_s4 = scalar_lea.hbm %s6150_s3, 16 }
 0x40a   :  { %p4772_p5 = scmp.ne.s32.totalorder %s6150_s3, %s4771_s4  ;;  %p4775_p6 = scmp.lt.u32.totalorder %s4771_s4, %s6150_s3 }
 0x40c   :  { %p4777_p7 = pnand %p4775_p6, %p4772_p5 }
 0x40e   :  { %4780 = shalt.err (!%p4777_p7)
}
 0x40f   :  { %3313 = dma.vmem_to_hbm [thread:$0]  %s3311_s26, 16, %s6150_s3, [#allocation3]  }
 0x410   :  { %4781 = dma.done.wait [#allocation3], 16  }
 0x411   :  { %4782 = vsyncadd [#allocation3], 4294967280 }
 0x412   :  { %3317 = vsyncpa [#allocation3], 1 }

</bundles_post_ra>
